<compile_context>
chip_gen: v6e
topology: v6e:2x2x1
jax: 0.10.0
libtpu: 0.0.40
codegen_flags: <defaults>
</compile_context>

<pallas_src>
import jax
import jax.numpy as jnp
import numpy as np
from jax.experimental import pallas as pl
from jax.experimental.pallas import tpu as pltpu


# -----------------------------------------------------------------------------
# Kernel
# -----------------------------------------------------------------------------
def _skipfeature_fusion_kernel(x1_ref, x2_ref, out_ref):
    # x1_ref / x2_ref block shape: (1, C, THW); out_ref block: (1, 2C, THW)
    C = x1_ref.shape[1]

    # Channel-index column, used to build static group membership masks.
    ch = jax.lax.broadcasted_iota(jnp.int32, (C, 1), 0)

    # Static group definitions mirroring the PyTorch slices
    #   t_{i+1} = x[:, i+1 : (64 if i < 3 else 65) : 4]   (silently clipped to C)
    group_defs = []
    for i in range(4):
        start = i + 1
        stop = min(64 if i < 3 else 65, C)
        n = (stop - start + 3) // 4  # number of channels in this group
        group_defs.append((start, stop, n))

    def weight_matrix(x):
        """Full (C, THW) weight matrix: row c = sigmoid(mean+max) of group (c%4)."""
        w_full = jnp.zeros_like(x)
        for i, (start, stop, n) in enumerate(group_defs):
            # Membership mask for the channels feeding this group's statistic.
            gmask = (ch % 4 == (start % 4)) & (ch >= start) & (ch < stop)  # (C, 1)
            s = jnp.sum(jnp.where(gmask, x, 0.0), axis=0, keepdims=True) * (1.0 / n)
            mx = jnp.max(jnp.where(gmask, x, -jnp.inf), axis=0, keepdims=True)
            w_i = jax.nn.sigmoid(s + mx)                                   # (1, THW)
            # Channels c with c % 4 == i are scaled by w_i.
            omask = (ch % 4 == i)                                          # (C, 1)
            w_full = jnp.where(omask, w_i, w_full)                         # (C, THW)
        return w_full

    x1 = x1_ref[0].astype(jnp.float32)  # (C, THW)
    x2 = x2_ref[0].astype(jnp.float32)  # (C, THW)

    w1 = weight_matrix(x1)  # weights from x1 scale x2 -> first output half
    w2 = weight_matrix(x2)  # weights from x2 scale x1 -> second output half

    # One dense (C, THW) store per output half.
    out_ref[0, :C, :] = (w1 * x2).astype(out_ref.dtype)
    out_ref[0, C:, :] = (w2 * x1).astype(out_ref.dtype)


# -----------------------------------------------------------------------------
# Wrapper
# -----------------------------------------------------------------------------
def _choose_spatial_tiling(HW, C, target_lanes=2048, vmem_budget_bytes=24 << 20):
    """Pick a lane-dense spatial tile (multiple of 128) and the padded HW."""
    hw128 = pl.cdiv(HW, 128) * 128

    # Conservative (f32) double-buffered VMEM per grid step:
    #   2 input blocks of (C, tile) + 1 output block of (2C, tile), x2 buffers.
    def db_bytes(tile):
        return 2 * (2 * C * tile + 2 * C * tile) * 4

    tile_units = max(1, min(target_lanes, hw128) // 128)
    while tile_units > 1 and db_bytes(tile_units * 128) > vmem_budget_bytes:
        tile_units //= 2
    tile = tile_units * 128

    # Re-balance tiles so padding waste stays small.
    steps = pl.cdiv(hw128, tile)
    tile = pl.cdiv(pl.cdiv(hw128, steps), 128) * 128
    return tile, steps * tile


def skipfeature_fusion(x1, x2, *, target_lanes=2048):
    assert x1.shape == x2.shape, "x1 and x2 must have identical shapes"
    B, C, H, W = x2.shape
    assert C % 4 == 0 and C >= 8, "need at least 2 channels per weight group"

    HW = H * W
    out_dtype = x2.dtype
    tile_hw, HW_pad = _choose_spatial_tiling(HW, C, target_lanes=target_lanes)
    n_spatial = HW_pad // tile_hw

    # Flatten spatial dims so H*W maps to a lane-dense last axis; pad to the
    # tile boundary (padded pixels are sliced off after the call).
    x1f = x1.reshape(B, C, HW)
    x2f = x2.reshape(B, C, HW)
    if HW_pad != HW:
        pad = ((0, 0), (0, 0), (0, HW_pad - HW))
        x1f = jnp.pad(x1f, pad)
        x2f = jnp.pad(x2f, pad)

    out = pl.pallas_call(
        _skipfeature_fusion_kernel,
        out_shape=jax.ShapeDtypeStruct((B, 2 * C, HW_pad), out_dtype),
        grid=(B, n_spatial),
        in_specs=[
            pl.BlockSpec((1, C, tile_hw), lambda b, s: (b, 0, s)),
            pl.BlockSpec((1, C, tile_hw), lambda b, s: (b, 0, s)),
        ],
        out_specs=pl.BlockSpec((1, 2 * C, tile_hw), lambda b, s: (b, 0, s)),
        compiler_params=pltpu.CompilerParams(
            dimension_semantics=("parallel", "parallel"),
        ),
    )(x1f, x2f)

    if HW_pad != HW:
        out = out[:, :, :HW]
    return out.reshape(B, 2 * C, H, W)


# -----------------------------------------------------------------------------
# Pure-JAX reference (mirrors the PyTorch forward) for verification
# -----------------------------------------------------------------------------
def _reference(x1, x2):
    def weights(x):
        C = x.shape[1]
        groups = [
            x[:, 1:min(64, C):4],
            x[:, 2:min(64, C):4],
            x[:, 3:min(64, C):4],
            x[:, 4:min(65, C):4],
        ]
        ws = [
            jax.nn.sigmoid(jnp.mean(g, axis=1, keepdims=True)
                           + jnp.max(g, axis=1, keepdims=True))
            for g in groups
        ]
        return jnp.concatenate(ws, axis=1)  # (B, 4, H, W)

    w1 = weights(x1)
    w2 = weights(x2)
    B, C, H, W = x2.shape
    result = jnp.zeros((B, C, H, W), jnp.float32)
    result1 = jnp.zeros((B, C, H, W), jnp.float32)
    for i in range(4):
        idx = np.arange(i, C, 4)
        result = result.at[:, idx].set(w1[:, i:i + 1] * x2[:, idx])
        result1 = result1.at[:, idx].set(w2[:, i:i + 1] * x1[:, idx])
    return jnp.concatenate([result, result1], axis=1)


if __name__ == "__main__":
    key = jax.random.PRNGKey(0)
    k1, k2 = jax.random.split(key)
    B, C, H, W = 2, 16, 16, 16
    x1 = jax.random.normal(k1, (B, C, H, W), dtype=jnp.float32)
    x2 = jax.random.normal(k2, (B, C, H, W), dtype=jnp.float32)

    out = jax.block_until_ready(skipfeature_fusion(x1, x2))
    ref = jax.block_until_ready(_reference(x1, x2))

    assert out.shape == (B, 2 * C, H, W)
    np.testing.assert_allclose(np.asarray(out), np.asarray(ref),
                               rtol=1e-5, atol=1e-5)
    print("KERNEL_OK")
</pallas_src>

<mosaic_0001>
module attributes {stable_mosaic.version = 11 : i64} {
  func.func @_skipfeature_fusion_kernel(%arg0: i32, %arg1: i32, %arg2: memref<1x16x256xf32, #tpu.memory_space<vmem>>, %arg3: memref<1x16x256xf32, #tpu.memory_space<vmem>>, %arg4: memref<1x32x256xf32, #tpu.memory_space<vmem>>) attributes {dimension_semantics = [#tpu.dimension_semantics<parallel>, #tpu.dimension_semantics<parallel>], iteration_bounds = array<i64: 2, 1>, scalar_prefetch = 0 : i64, scratch_operands = 0 : i64, tpu.core_type = #tpu.core_type<tc>, window_params = [{transform_indices = @transform_0, window_bounds = array<i64: 1, 16, 256>}, {transform_indices = @transform_1, window_bounds = array<i64: 1, 16, 256>}, {transform_indices = @transform_2, window_bounds = array<i64: 1, 32, 256>}]} {
    %0 = tpu.iota {dimensions = array<i32: 0>} : vector<16x1xi32>
    %c0 = arith.constant 0 : index
    %c0_0 = arith.constant 0 : index
    %c0_1 = arith.constant 0 : index
    %1 = vector.load %arg2[%c0, %c0_0, %c0_1] : memref<1x16x256xf32, #tpu.memory_space<vmem>>, vector<1x16x256xf32>
    %2 = vector.shape_cast %1 : vector<1x16x256xf32> to vector<16x256xf32>
    %c0_2 = arith.constant 0 : index
    %c0_3 = arith.constant 0 : index
    %c0_4 = arith.constant 0 : index
    %3 = vector.load %arg3[%c0_2, %c0_3, %c0_4] : memref<1x16x256xf32, #tpu.memory_space<vmem>>, vector<1x16x256xf32>
    %4 = vector.shape_cast %3 : vector<1x16x256xf32> to vector<16x256xf32>
    %cst = arith.constant 0.000000e+00 : f32
    %5 = vector.broadcast %cst : f32 to vector<16x256xf32>
    %c4_i32 = arith.constant 4 : i32
    %c0_i32 = arith.constant 0 : i32
    %6 = arith.cmpi eq, %c4_i32, %c0_i32 : i32
    %c1_i32 = arith.constant 1 : i32
    %7 = arith.select %6, %c1_i32, %c4_i32 : i32
    %8 = vector.broadcast %7 : i32 to vector<16x1xi32>
    %9 = arith.remsi %0, %8 : vector<16x1xi32>
    %c0_i32_5 = arith.constant 0 : i32
    %10 = vector.broadcast %c0_i32_5 : i32 to vector<16x1xi32>
    %11 = arith.cmpi ne, %9, %10 : vector<16x1xi32>
    %c0_i32_6 = arith.constant 0 : i32
    %12 = vector.broadcast %c0_i32_6 : i32 to vector<16x1xi32>
    %13 = arith.cmpi slt, %9, %12 : vector<16x1xi32>
    %c0_i32_7 = arith.constant 0 : i32
    %14 = arith.cmpi slt, %7, %c0_i32_7 : i32
    %15 = vector.broadcast %14 : i1 to vector<16x1xi1>
    %16 = vector.broadcast %15 : vector<16x1xi1> to vector<16x1xi1>
    %17 = arith.xori %13, %16 : vector<16x1xi1>
    %18 = arith.andi %17, %11 : vector<16x1xi1>
    %19 = vector.broadcast %7 : i32 to vector<16x1xi32>
    %20 = arith.addi %9, %19 : vector<16x1xi32>
    %21 = arith.select %18, %20, %9 : vector<16x1xi1>, vector<16x1xi32>
    %c1_i32_8 = arith.constant 1 : i32
    %22 = vector.broadcast %c1_i32_8 : i32 to vector<16x1xi32>
    %23 = arith.cmpi eq, %21, %22 : vector<16x1xi32>
    %c1_i32_9 = arith.constant 1 : i32
    %24 = vector.broadcast %c1_i32_9 : i32 to vector<16x1xi32>
    %25 = arith.cmpi sge, %0, %24 : vector<16x1xi32>
    %26 = arith.andi %23, %25 : vector<16x1xi1>
    %c16_i32 = arith.constant 16 : i32
    %27 = vector.broadcast %c16_i32 : i32 to vector<16x1xi32>
    %28 = arith.cmpi slt, %0, %27 : vector<16x1xi32>
    %29 = arith.andi %26, %28 : vector<16x1xi1>
    %cst_10 = arith.constant 0.000000e+00 : f32
    %30 = vector.shape_cast %29 : vector<16x1xi1> to vector<16x1xi1>
    %31 = vector.broadcast %30 : vector<16x1xi1> to vector<16x256xi1>
    %32 = vector.broadcast %cst_10 : f32 to vector<16x256xf32>
    %33 = arith.select %31, %2, %32 : vector<16x256xi1>, vector<16x256xf32>
    %cst_11 = arith.constant dense<0.000000e+00> : vector<256xf32>
    %34 = vector.multi_reduction <add>, %33, %cst_11 [0] : vector<16x256xf32> to vector<256xf32>
    %35 = vector.shape_cast %34 : vector<256xf32> to vector<1x256xf32>
    %cst_12 = arith.constant 2.500000e-01 : f32
    %36 = vector.broadcast %cst_12 : f32 to vector<1x256xf32>
    %37 = arith.mulf %35, %36 : vector<1x256xf32>
    %cst_13 = arith.constant 0xFF800000 : f32
    %38 = vector.shape_cast %29 : vector<16x1xi1> to vector<16x1xi1>
    %39 = vector.broadcast %38 : vector<16x1xi1> to vector<16x256xi1>
    %40 = vector.broadcast %cst_13 : f32 to vector<16x256xf32>
    %41 = arith.select %39, %2, %40 : vector<16x256xi1>, vector<16x256xf32>
    %cst_14 = arith.constant dense<0xFF800000> : vector<256xf32>
    %42 = vector.multi_reduction <maximumf>, %41, %cst_14 [0] : vector<16x256xf32> to vector<256xf32>
    %43 = vector.shape_cast %42 : vector<256xf32> to vector<1x256xf32>
    %44 = arith.addf %37, %43 : vector<1x256xf32>
    %45 = arith.negf %44 : vector<1x256xf32>
    %46 = math.exp %45 : vector<1x256xf32>
    %cst_15 = arith.constant 1.000000e+00 : f32
    %47 = vector.broadcast %cst_15 : f32 to vector<1x256xf32>
    %48 = arith.addf %47, %46 : vector<1x256xf32>
    %49 = arith.divf %47, %48 : vector<1x256xf32>
    %c4_i32_16 = arith.constant 4 : i32
    %c0_i32_17 = arith.constant 0 : i32
    %50 = arith.cmpi eq, %c4_i32_16, %c0_i32_17 : i32
    %c1_i32_18 = arith.constant 1 : i32
    %51 = arith.select %50, %c1_i32_18, %c4_i32_16 : i32
    %52 = vector.broadcast %51 : i32 to vector<16x1xi32>
    %53 = arith.remsi %0, %52 : vector<16x1xi32>
    %c0_i32_19 = arith.constant 0 : i32
    %54 = vector.broadcast %c0_i32_19 : i32 to vector<16x1xi32>
    %55 = arith.cmpi ne, %53, %54 : vector<16x1xi32>
    %c0_i32_20 = arith.constant 0 : i32
    %56 = vector.broadcast %c0_i32_20 : i32 to vector<16x1xi32>
    %57 = arith.cmpi slt, %53, %56 : vector<16x1xi32>
    %c0_i32_21 = arith.constant 0 : i32
    %58 = arith.cmpi slt, %51, %c0_i32_21 : i32
    %59 = vector.broadcast %58 : i1 to vector<16x1xi1>
    %60 = vector.broadcast %59 : vector<16x1xi1> to vector<16x1xi1>
    %61 = arith.xori %57, %60 : vector<16x1xi1>
    %62 = arith.andi %61, %55 : vector<16x1xi1>
    %63 = vector.broadcast %51 : i32 to vector<16x1xi32>
    %64 = arith.addi %53, %63 : vector<16x1xi32>
    %65 = arith.select %62, %64, %53 : vector<16x1xi1>, vector<16x1xi32>
    %c0_i32_22 = arith.constant 0 : i32
    %66 = vector.broadcast %c0_i32_22 : i32 to vector<16x1xi32>
    %67 = arith.cmpi eq, %65, %66 : vector<16x1xi32>
    %68 = vector.shape_cast %67 : vector<16x1xi1> to vector<16x1xi1>
    %69 = vector.broadcast %68 : vector<16x1xi1> to vector<16x256xi1>
    %70 = vector.shape_cast %49 : vector<1x256xf32> to vector<1x256xf32>
    %71 = vector.broadcast %70 : vector<1x256xf32> to vector<16x256xf32>
    %72 = arith.select %69, %71, %5 : vector<16x256xi1>, vector<16x256xf32>
    %c4_i32_23 = arith.constant 4 : i32
    %c0_i32_24 = arith.constant 0 : i32
    %73 = arith.cmpi eq, %c4_i32_23, %c0_i32_24 : i32
    %c1_i32_25 = arith.constant 1 : i32
    %74 = arith.select %73, %c1_i32_25, %c4_i32_23 : i32
    %75 = vector.broadcast %74 : i32 to vector<16x1xi32>
    %76 = arith.remsi %0, %75 : vector<16x1xi32>
    %c0_i32_26 = arith.constant 0 : i32
    %77 = vector.broadcast %c0_i32_26 : i32 to vector<16x1xi32>
    %78 = arith.cmpi ne, %76, %77 : vector<16x1xi32>
    %c0_i32_27 = arith.constant 0 : i32
    %79 = vector.broadcast %c0_i32_27 : i32 to vector<16x1xi32>
    %80 = arith.cmpi slt, %76, %79 : vector<16x1xi32>
    %c0_i32_28 = arith.constant 0 : i32
    %81 = arith.cmpi slt, %74, %c0_i32_28 : i32
    %82 = vector.broadcast %81 : i1 to vector<16x1xi1>
    %83 = vector.broadcast %82 : vector<16x1xi1> to vector<16x1xi1>
    %84 = arith.xori %80, %83 : vector<16x1xi1>
    %85 = arith.andi %84, %78 : vector<16x1xi1>
    %86 = vector.broadcast %74 : i32 to vector<16x1xi32>
    %87 = arith.addi %76, %86 : vector<16x1xi32>
    %88 = arith.select %85, %87, %76 : vector<16x1xi1>, vector<16x1xi32>
    %c2_i32 = arith.constant 2 : i32
    %89 = vector.broadcast %c2_i32 : i32 to vector<16x1xi32>
    %90 = arith.cmpi eq, %88, %89 : vector<16x1xi32>
    %c2_i32_29 = arith.constant 2 : i32
    %91 = vector.broadcast %c2_i32_29 : i32 to vector<16x1xi32>
    %92 = arith.cmpi sge, %0, %91 : vector<16x1xi32>
    %93 = arith.andi %90, %92 : vector<16x1xi1>
    %c16_i32_30 = arith.constant 16 : i32
    %94 = vector.broadcast %c16_i32_30 : i32 to vector<16x1xi32>
    %95 = arith.cmpi slt, %0, %94 : vector<16x1xi32>
    %96 = arith.andi %93, %95 : vector<16x1xi1>
    %cst_31 = arith.constant 0.000000e+00 : f32
    %97 = vector.shape_cast %96 : vector<16x1xi1> to vector<16x1xi1>
    %98 = vector.broadcast %97 : vector<16x1xi1> to vector<16x256xi1>
    %99 = vector.broadcast %cst_31 : f32 to vector<16x256xf32>
    %100 = arith.select %98, %2, %99 : vector<16x256xi1>, vector<16x256xf32>
    %cst_32 = arith.constant dense<0.000000e+00> : vector<256xf32>
    %101 = vector.multi_reduction <add>, %100, %cst_32 [0] : vector<16x256xf32> to vector<256xf32>
    %102 = vector.shape_cast %101 : vector<256xf32> to vector<1x256xf32>
    %cst_33 = arith.constant 2.500000e-01 : f32
    %103 = vector.broadcast %cst_33 : f32 to vector<1x256xf32>
    %104 = arith.mulf %102, %103 : vector<1x256xf32>
    %cst_34 = arith.constant 0xFF800000 : f32
    %105 = vector.shape_cast %96 : vector<16x1xi1> to vector<16x1xi1>
    %106 = vector.broadcast %105 : vector<16x1xi1> to vector<16x256xi1>
    %107 = vector.broadcast %cst_34 : f32 to vector<16x256xf32>
    %108 = arith.select %106, %2, %107 : vector<16x256xi1>, vector<16x256xf32>
    %cst_35 = arith.constant dense<0xFF800000> : vector<256xf32>
    %109 = vector.multi_reduction <maximumf>, %108, %cst_35 [0] : vector<16x256xf32> to vector<256xf32>
    %110 = vector.shape_cast %109 : vector<256xf32> to vector<1x256xf32>
    %111 = arith.addf %104, %110 : vector<1x256xf32>
    %112 = arith.negf %111 : vector<1x256xf32>
    %113 = math.exp %112 : vector<1x256xf32>
    %cst_36 = arith.constant 1.000000e+00 : f32
    %114 = vector.broadcast %cst_36 : f32 to vector<1x256xf32>
    %115 = arith.addf %114, %113 : vector<1x256xf32>
    %116 = arith.divf %114, %115 : vector<1x256xf32>
    %c4_i32_37 = arith.constant 4 : i32
    %c0_i32_38 = arith.constant 0 : i32
    %117 = arith.cmpi eq, %c4_i32_37, %c0_i32_38 : i32
    %c1_i32_39 = arith.constant 1 : i32
    %118 = arith.select %117, %c1_i32_39, %c4_i32_37 : i32
    %119 = vector.broadcast %118 : i32 to vector<16x1xi32>
    %120 = arith.remsi %0, %119 : vector<16x1xi32>
    %c0_i32_40 = arith.constant 0 : i32
    %121 = vector.broadcast %c0_i32_40 : i32 to vector<16x1xi32>
    %122 = arith.cmpi ne, %120, %121 : vector<16x1xi32>
    %c0_i32_41 = arith.constant 0 : i32
    %123 = vector.broadcast %c0_i32_41 : i32 to vector<16x1xi32>
    %124 = arith.cmpi slt, %120, %123 : vector<16x1xi32>
    %c0_i32_42 = arith.constant 0 : i32
    %125 = arith.cmpi slt, %118, %c0_i32_42 : i32
    %126 = vector.broadcast %125 : i1 to vector<16x1xi1>
    %127 = vector.broadcast %126 : vector<16x1xi1> to vector<16x1xi1>
    %128 = arith.xori %124, %127 : vector<16x1xi1>
    %129 = arith.andi %128, %122 : vector<16x1xi1>
    %130 = vector.broadcast %118 : i32 to vector<16x1xi32>
    %131 = arith.addi %120, %130 : vector<16x1xi32>
    %132 = arith.select %129, %131, %120 : vector<16x1xi1>, vector<16x1xi32>
    %c1_i32_43 = arith.constant 1 : i32
    %133 = vector.broadcast %c1_i32_43 : i32 to vector<16x1xi32>
    %134 = arith.cmpi eq, %132, %133 : vector<16x1xi32>
    %135 = vector.shape_cast %134 : vector<16x1xi1> to vector<16x1xi1>
    %136 = vector.broadcast %135 : vector<16x1xi1> to vector<16x256xi1>
    %137 = vector.shape_cast %116 : vector<1x256xf32> to vector<1x256xf32>
    %138 = vector.broadcast %137 : vector<1x256xf32> to vector<16x256xf32>
    %139 = arith.select %136, %138, %72 : vector<16x256xi1>, vector<16x256xf32>
    %c4_i32_44 = arith.constant 4 : i32
    %c0_i32_45 = arith.constant 0 : i32
    %140 = arith.cmpi eq, %c4_i32_44, %c0_i32_45 : i32
    %c1_i32_46 = arith.constant 1 : i32
    %141 = arith.select %140, %c1_i32_46, %c4_i32_44 : i32
    %142 = vector.broadcast %141 : i32 to vector<16x1xi32>
    %143 = arith.remsi %0, %142 : vector<16x1xi32>
    %c0_i32_47 = arith.constant 0 : i32
    %144 = vector.broadcast %c0_i32_47 : i32 to vector<16x1xi32>
    %145 = arith.cmpi ne, %143, %144 : vector<16x1xi32>
    %c0_i32_48 = arith.constant 0 : i32
    %146 = vector.broadcast %c0_i32_48 : i32 to vector<16x1xi32>
    %147 = arith.cmpi slt, %143, %146 : vector<16x1xi32>
    %c0_i32_49 = arith.constant 0 : i32
    %148 = arith.cmpi slt, %141, %c0_i32_49 : i32
    %149 = vector.broadcast %148 : i1 to vector<16x1xi1>
    %150 = vector.broadcast %149 : vector<16x1xi1> to vector<16x1xi1>
    %151 = arith.xori %147, %150 : vector<16x1xi1>
    %152 = arith.andi %151, %145 : vector<16x1xi1>
    %153 = vector.broadcast %141 : i32 to vector<16x1xi32>
    %154 = arith.addi %143, %153 : vector<16x1xi32>
    %155 = arith.select %152, %154, %143 : vector<16x1xi1>, vector<16x1xi32>
    %c3_i32 = arith.constant 3 : i32
    %156 = vector.broadcast %c3_i32 : i32 to vector<16x1xi32>
    %157 = arith.cmpi eq, %155, %156 : vector<16x1xi32>
    %c3_i32_50 = arith.constant 3 : i32
    %158 = vector.broadcast %c3_i32_50 : i32 to vector<16x1xi32>
    %159 = arith.cmpi sge, %0, %158 : vector<16x1xi32>
    %160 = arith.andi %157, %159 : vector<16x1xi1>
    %c16_i32_51 = arith.constant 16 : i32
    %161 = vector.broadcast %c16_i32_51 : i32 to vector<16x1xi32>
    %162 = arith.cmpi slt, %0, %161 : vector<16x1xi32>
    %163 = arith.andi %160, %162 : vector<16x1xi1>
    %cst_52 = arith.constant 0.000000e+00 : f32
    %164 = vector.shape_cast %163 : vector<16x1xi1> to vector<16x1xi1>
    %165 = vector.broadcast %164 : vector<16x1xi1> to vector<16x256xi1>
    %166 = vector.broadcast %cst_52 : f32 to vector<16x256xf32>
    %167 = arith.select %165, %2, %166 : vector<16x256xi1>, vector<16x256xf32>
    %cst_53 = arith.constant dense<0.000000e+00> : vector<256xf32>
    %168 = vector.multi_reduction <add>, %167, %cst_53 [0] : vector<16x256xf32> to vector<256xf32>
    %169 = vector.shape_cast %168 : vector<256xf32> to vector<1x256xf32>
    %cst_54 = arith.constant 2.500000e-01 : f32
    %170 = vector.broadcast %cst_54 : f32 to vector<1x256xf32>
    %171 = arith.mulf %169, %170 : vector<1x256xf32>
    %cst_55 = arith.constant 0xFF800000 : f32
    %172 = vector.shape_cast %163 : vector<16x1xi1> to vector<16x1xi1>
    %173 = vector.broadcast %172 : vector<16x1xi1> to vector<16x256xi1>
    %174 = vector.broadcast %cst_55 : f32 to vector<16x256xf32>
    %175 = arith.select %173, %2, %174 : vector<16x256xi1>, vector<16x256xf32>
    %cst_56 = arith.constant dense<0xFF800000> : vector<256xf32>
    %176 = vector.multi_reduction <maximumf>, %175, %cst_56 [0] : vector<16x256xf32> to vector<256xf32>
    %177 = vector.shape_cast %176 : vector<256xf32> to vector<1x256xf32>
    %178 = arith.addf %171, %177 : vector<1x256xf32>
    %179 = arith.negf %178 : vector<1x256xf32>
    %180 = math.exp %179 : vector<1x256xf32>
    %cst_57 = arith.constant 1.000000e+00 : f32
    %181 = vector.broadcast %cst_57 : f32 to vector<1x256xf32>
    %182 = arith.addf %181, %180 : vector<1x256xf32>
    %183 = arith.divf %181, %182 : vector<1x256xf32>
    %c4_i32_58 = arith.constant 4 : i32
    %c0_i32_59 = arith.constant 0 : i32
    %184 = arith.cmpi eq, %c4_i32_58, %c0_i32_59 : i32
    %c1_i32_60 = arith.constant 1 : i32
    %185 = arith.select %184, %c1_i32_60, %c4_i32_58 : i32
    %186 = vector.broadcast %185 : i32 to vector<16x1xi32>
    %187 = arith.remsi %0, %186 : vector<16x1xi32>
    %c0_i32_61 = arith.constant 0 : i32
    %188 = vector.broadcast %c0_i32_61 : i32 to vector<16x1xi32>
    %189 = arith.cmpi ne, %187, %188 : vector<16x1xi32>
    %c0_i32_62 = arith.constant 0 : i32
    %190 = vector.broadcast %c0_i32_62 : i32 to vector<16x1xi32>
    %191 = arith.cmpi slt, %187, %190 : vector<16x1xi32>
    %c0_i32_63 = arith.constant 0 : i32
    %192 = arith.cmpi slt, %185, %c0_i32_63 : i32
    %193 = vector.broadcast %192 : i1 to vector<16x1xi1>
    %194 = vector.broadcast %193 : vector<16x1xi1> to vector<16x1xi1>
    %195 = arith.xori %191, %194 : vector<16x1xi1>
    %196 = arith.andi %195, %189 : vector<16x1xi1>
    %197 = vector.broadcast %185 : i32 to vector<16x1xi32>
    %198 = arith.addi %187, %197 : vector<16x1xi32>
    %199 = arith.select %196, %198, %187 : vector<16x1xi1>, vector<16x1xi32>
    %c2_i32_64 = arith.constant 2 : i32
    %200 = vector.broadcast %c2_i32_64 : i32 to vector<16x1xi32>
    %201 = arith.cmpi eq, %199, %200 : vector<16x1xi32>
    %202 = vector.shape_cast %201 : vector<16x1xi1> to vector<16x1xi1>
    %203 = vector.broadcast %202 : vector<16x1xi1> to vector<16x256xi1>
    %204 = vector.shape_cast %183 : vector<1x256xf32> to vector<1x256xf32>
    %205 = vector.broadcast %204 : vector<1x256xf32> to vector<16x256xf32>
    %206 = arith.select %203, %205, %139 : vector<16x256xi1>, vector<16x256xf32>
    %c4_i32_65 = arith.constant 4 : i32
    %c0_i32_66 = arith.constant 0 : i32
    %207 = arith.cmpi eq, %c4_i32_65, %c0_i32_66 : i32
    %c1_i32_67 = arith.constant 1 : i32
    %208 = arith.select %207, %c1_i32_67, %c4_i32_65 : i32
    %209 = vector.broadcast %208 : i32 to vector<16x1xi32>
    %210 = arith.remsi %0, %209 : vector<16x1xi32>
    %c0_i32_68 = arith.constant 0 : i32
    %211 = vector.broadcast %c0_i32_68 : i32 to vector<16x1xi32>
    %212 = arith.cmpi ne, %210, %211 : vector<16x1xi32>
    %c0_i32_69 = arith.constant 0 : i32
    %213 = vector.broadcast %c0_i32_69 : i32 to vector<16x1xi32>
    %214 = arith.cmpi slt, %210, %213 : vector<16x1xi32>
    %c0_i32_70 = arith.constant 0 : i32
    %215 = arith.cmpi slt, %208, %c0_i32_70 : i32
    %216 = vector.broadcast %215 : i1 to vector<16x1xi1>
    %217 = vector.broadcast %216 : vector<16x1xi1> to vector<16x1xi1>
    %218 = arith.xori %214, %217 : vector<16x1xi1>
    %219 = arith.andi %218, %212 : vector<16x1xi1>
    %220 = vector.broadcast %208 : i32 to vector<16x1xi32>
    %221 = arith.addi %210, %220 : vector<16x1xi32>
    %222 = arith.select %219, %221, %210 : vector<16x1xi1>, vector<16x1xi32>
    %c0_i32_71 = arith.constant 0 : i32
    %223 = vector.broadcast %c0_i32_71 : i32 to vector<16x1xi32>
    %224 = arith.cmpi eq, %222, %223 : vector<16x1xi32>
    %c4_i32_72 = arith.constant 4 : i32
    %225 = vector.broadcast %c4_i32_72 : i32 to vector<16x1xi32>
    %226 = arith.cmpi sge, %0, %225 : vector<16x1xi32>
    %227 = arith.andi %224, %226 : vector<16x1xi1>
    %c16_i32_73 = arith.constant 16 : i32
    %228 = vector.broadcast %c16_i32_73 : i32 to vector<16x1xi32>
    %229 = arith.cmpi slt, %0, %228 : vector<16x1xi32>
    %230 = arith.andi %227, %229 : vector<16x1xi1>
    %cst_74 = arith.constant 0.000000e+00 : f32
    %231 = vector.shape_cast %230 : vector<16x1xi1> to vector<16x1xi1>
    %232 = vector.broadcast %231 : vector<16x1xi1> to vector<16x256xi1>
    %233 = vector.broadcast %cst_74 : f32 to vector<16x256xf32>
    %234 = arith.select %232, %2, %233 : vector<16x256xi1>, vector<16x256xf32>
    %cst_75 = arith.constant dense<0.000000e+00> : vector<256xf32>
    %235 = vector.multi_reduction <add>, %234, %cst_75 [0] : vector<16x256xf32> to vector<256xf32>
    %236 = vector.shape_cast %235 : vector<256xf32> to vector<1x256xf32>
    %cst_76 = arith.constant 0.333333343 : f32
    %237 = vector.broadcast %cst_76 : f32 to vector<1x256xf32>
    %238 = arith.mulf %236, %237 : vector<1x256xf32>
    %cst_77 = arith.constant 0xFF800000 : f32
    %239 = vector.shape_cast %230 : vector<16x1xi1> to vector<16x1xi1>
    %240 = vector.broadcast %239 : vector<16x1xi1> to vector<16x256xi1>
    %241 = vector.broadcast %cst_77 : f32 to vector<16x256xf32>
    %242 = arith.select %240, %2, %241 : vector<16x256xi1>, vector<16x256xf32>
    %cst_78 = arith.constant dense<0xFF800000> : vector<256xf32>
    %243 = vector.multi_reduction <maximumf>, %242, %cst_78 [0] : vector<16x256xf32> to vector<256xf32>
    %244 = vector.shape_cast %243 : vector<256xf32> to vector<1x256xf32>
    %245 = arith.addf %238, %244 : vector<1x256xf32>
    %246 = arith.negf %245 : vector<1x256xf32>
    %247 = math.exp %246 : vector<1x256xf32>
    %cst_79 = arith.constant 1.000000e+00 : f32
    %248 = vector.broadcast %cst_79 : f32 to vector<1x256xf32>
    %249 = arith.addf %248, %247 : vector<1x256xf32>
    %250 = arith.divf %248, %249 : vector<1x256xf32>
    %c4_i32_80 = arith.constant 4 : i32
    %c0_i32_81 = arith.constant 0 : i32
    %251 = arith.cmpi eq, %c4_i32_80, %c0_i32_81 : i32
    %c1_i32_82 = arith.constant 1 : i32
    %252 = arith.select %251, %c1_i32_82, %c4_i32_80 : i32
    %253 = vector.broadcast %252 : i32 to vector<16x1xi32>
    %254 = arith.remsi %0, %253 : vector<16x1xi32>
    %c0_i32_83 = arith.constant 0 : i32
    %255 = vector.broadcast %c0_i32_83 : i32 to vector<16x1xi32>
    %256 = arith.cmpi ne, %254, %255 : vector<16x1xi32>
    %c0_i32_84 = arith.constant 0 : i32
    %257 = vector.broadcast %c0_i32_84 : i32 to vector<16x1xi32>
    %258 = arith.cmpi slt, %254, %257 : vector<16x1xi32>
    %c0_i32_85 = arith.constant 0 : i32
    %259 = arith.cmpi slt, %252, %c0_i32_85 : i32
    %260 = vector.broadcast %259 : i1 to vector<16x1xi1>
    %261 = vector.broadcast %260 : vector<16x1xi1> to vector<16x1xi1>
    %262 = arith.xori %258, %261 : vector<16x1xi1>
    %263 = arith.andi %262, %256 : vector<16x1xi1>
    %264 = vector.broadcast %252 : i32 to vector<16x1xi32>
    %265 = arith.addi %254, %264 : vector<16x1xi32>
    %266 = arith.select %263, %265, %254 : vector<16x1xi1>, vector<16x1xi32>
    %c3_i32_86 = arith.constant 3 : i32
    %267 = vector.broadcast %c3_i32_86 : i32 to vector<16x1xi32>
    %268 = arith.cmpi eq, %266, %267 : vector<16x1xi32>
    %269 = vector.shape_cast %268 : vector<16x1xi1> to vector<16x1xi1>
    %270 = vector.broadcast %269 : vector<16x1xi1> to vector<16x256xi1>
    %271 = vector.shape_cast %250 : vector<1x256xf32> to vector<1x256xf32>
    %272 = vector.broadcast %271 : vector<1x256xf32> to vector<16x256xf32>
    %273 = arith.select %270, %272, %206 : vector<16x256xi1>, vector<16x256xf32>
    %cst_87 = arith.constant 0.000000e+00 : f32
    %274 = vector.broadcast %cst_87 : f32 to vector<16x256xf32>
    %c4_i32_88 = arith.constant 4 : i32
    %c0_i32_89 = arith.constant 0 : i32
    %275 = arith.cmpi eq, %c4_i32_88, %c0_i32_89 : i32
    %c1_i32_90 = arith.constant 1 : i32
    %276 = arith.select %275, %c1_i32_90, %c4_i32_88 : i32
    %277 = vector.broadcast %276 : i32 to vector<16x1xi32>
    %278 = arith.remsi %0, %277 : vector<16x1xi32>
    %c0_i32_91 = arith.constant 0 : i32
    %279 = vector.broadcast %c0_i32_91 : i32 to vector<16x1xi32>
    %280 = arith.cmpi ne, %278, %279 : vector<16x1xi32>
    %c0_i32_92 = arith.constant 0 : i32
    %281 = vector.broadcast %c0_i32_92 : i32 to vector<16x1xi32>
    %282 = arith.cmpi slt, %278, %281 : vector<16x1xi32>
    %c0_i32_93 = arith.constant 0 : i32
    %283 = arith.cmpi slt, %276, %c0_i32_93 : i32
    %284 = vector.broadcast %283 : i1 to vector<16x1xi1>
    %285 = vector.broadcast %284 : vector<16x1xi1> to vector<16x1xi1>
    %286 = arith.xori %282, %285 : vector<16x1xi1>
    %287 = arith.andi %286, %280 : vector<16x1xi1>
    %288 = vector.broadcast %276 : i32 to vector<16x1xi32>
    %289 = arith.addi %278, %288 : vector<16x1xi32>
    %290 = arith.select %287, %289, %278 : vector<16x1xi1>, vector<16x1xi32>
    %c1_i32_94 = arith.constant 1 : i32
    %291 = vector.broadcast %c1_i32_94 : i32 to vector<16x1xi32>
    %292 = arith.cmpi eq, %290, %291 : vector<16x1xi32>
    %c1_i32_95 = arith.constant 1 : i32
    %293 = vector.broadcast %c1_i32_95 : i32 to vector<16x1xi32>
    %294 = arith.cmpi sge, %0, %293 : vector<16x1xi32>
    %295 = arith.andi %292, %294 : vector<16x1xi1>
    %c16_i32_96 = arith.constant 16 : i32
    %296 = vector.broadcast %c16_i32_96 : i32 to vector<16x1xi32>
    %297 = arith.cmpi slt, %0, %296 : vector<16x1xi32>
    %298 = arith.andi %295, %297 : vector<16x1xi1>
    %cst_97 = arith.constant 0.000000e+00 : f32
    %299 = vector.shape_cast %298 : vector<16x1xi1> to vector<16x1xi1>
    %300 = vector.broadcast %299 : vector<16x1xi1> to vector<16x256xi1>
    %301 = vector.broadcast %cst_97 : f32 to vector<16x256xf32>
    %302 = arith.select %300, %4, %301 : vector<16x256xi1>, vector<16x256xf32>
    %cst_98 = arith.constant dense<0.000000e+00> : vector<256xf32>
    %303 = vector.multi_reduction <add>, %302, %cst_98 [0] : vector<16x256xf32> to vector<256xf32>
    %304 = vector.shape_cast %303 : vector<256xf32> to vector<1x256xf32>
    %cst_99 = arith.constant 2.500000e-01 : f32
    %305 = vector.broadcast %cst_99 : f32 to vector<1x256xf32>
    %306 = arith.mulf %304, %305 : vector<1x256xf32>
    %cst_100 = arith.constant 0xFF800000 : f32
    %307 = vector.shape_cast %298 : vector<16x1xi1> to vector<16x1xi1>
    %308 = vector.broadcast %307 : vector<16x1xi1> to vector<16x256xi1>
    %309 = vector.broadcast %cst_100 : f32 to vector<16x256xf32>
    %310 = arith.select %308, %4, %309 : vector<16x256xi1>, vector<16x256xf32>
    %cst_101 = arith.constant dense<0xFF800000> : vector<256xf32>
    %311 = vector.multi_reduction <maximumf>, %310, %cst_101 [0] : vector<16x256xf32> to vector<256xf32>
    %312 = vector.shape_cast %311 : vector<256xf32> to vector<1x256xf32>
    %313 = arith.addf %306, %312 : vector<1x256xf32>
    %314 = arith.negf %313 : vector<1x256xf32>
    %315 = math.exp %314 : vector<1x256xf32>
    %cst_102 = arith.constant 1.000000e+00 : f32
    %316 = vector.broadcast %cst_102 : f32 to vector<1x256xf32>
    %317 = arith.addf %316, %315 : vector<1x256xf32>
    %318 = arith.divf %316, %317 : vector<1x256xf32>
    %c4_i32_103 = arith.constant 4 : i32
    %c0_i32_104 = arith.constant 0 : i32
    %319 = arith.cmpi eq, %c4_i32_103, %c0_i32_104 : i32
    %c1_i32_105 = arith.constant 1 : i32
    %320 = arith.select %319, %c1_i32_105, %c4_i32_103 : i32
    %321 = vector.broadcast %320 : i32 to vector<16x1xi32>
    %322 = arith.remsi %0, %321 : vector<16x1xi32>
    %c0_i32_106 = arith.constant 0 : i32
    %323 = vector.broadcast %c0_i32_106 : i32 to vector<16x1xi32>
    %324 = arith.cmpi ne, %322, %323 : vector<16x1xi32>
    %c0_i32_107 = arith.constant 0 : i32
    %325 = vector.broadcast %c0_i32_107 : i32 to vector<16x1xi32>
    %326 = arith.cmpi slt, %322, %325 : vector<16x1xi32>
    %c0_i32_108 = arith.constant 0 : i32
    %327 = arith.cmpi slt, %320, %c0_i32_108 : i32
    %328 = vector.broadcast %327 : i1 to vector<16x1xi1>
    %329 = vector.broadcast %328 : vector<16x1xi1> to vector<16x1xi1>
    %330 = arith.xori %326, %329 : vector<16x1xi1>
    %331 = arith.andi %330, %324 : vector<16x1xi1>
    %332 = vector.broadcast %320 : i32 to vector<16x1xi32>
    %333 = arith.addi %322, %332 : vector<16x1xi32>
    %334 = arith.select %331, %333, %322 : vector<16x1xi1>, vector<16x1xi32>
    %c0_i32_109 = arith.constant 0 : i32
    %335 = vector.broadcast %c0_i32_109 : i32 to vector<16x1xi32>
    %336 = arith.cmpi eq, %334, %335 : vector<16x1xi32>
    %337 = vector.shape_cast %336 : vector<16x1xi1> to vector<16x1xi1>
    %338 = vector.broadcast %337 : vector<16x1xi1> to vector<16x256xi1>
    %339 = vector.shape_cast %318 : vector<1x256xf32> to vector<1x256xf32>
    %340 = vector.broadcast %339 : vector<1x256xf32> to vector<16x256xf32>
    %341 = arith.select %338, %340, %274 : vector<16x256xi1>, vector<16x256xf32>
    %c4_i32_110 = arith.constant 4 : i32
    %c0_i32_111 = arith.constant 0 : i32
    %342 = arith.cmpi eq, %c4_i32_110, %c0_i32_111 : i32
    %c1_i32_112 = arith.constant 1 : i32
    %343 = arith.select %342, %c1_i32_112, %c4_i32_110 : i32
    %344 = vector.broadcast %343 : i32 to vector<16x1xi32>
    %345 = arith.remsi %0, %344 : vector<16x1xi32>
    %c0_i32_113 = arith.constant 0 : i32
    %346 = vector.broadcast %c0_i32_113 : i32 to vector<16x1xi32>
    %347 = arith.cmpi ne, %345, %346 : vector<16x1xi32>
    %c0_i32_114 = arith.constant 0 : i32
    %348 = vector.broadcast %c0_i32_114 : i32 to vector<16x1xi32>
    %349 = arith.cmpi slt, %345, %348 : vector<16x1xi32>
    %c0_i32_115 = arith.constant 0 : i32
    %350 = arith.cmpi slt, %343, %c0_i32_115 : i32
    %351 = vector.broadcast %350 : i1 to vector<16x1xi1>
    %352 = vector.broadcast %351 : vector<16x1xi1> to vector<16x1xi1>
    %353 = arith.xori %349, %352 : vector<16x1xi1>
    %354 = arith.andi %353, %347 : vector<16x1xi1>
    %355 = vector.broadcast %343 : i32 to vector<16x1xi32>
    %356 = arith.addi %345, %355 : vector<16x1xi32>
    %357 = arith.select %354, %356, %345 : vector<16x1xi1>, vector<16x1xi32>
    %c2_i32_116 = arith.constant 2 : i32
    %358 = vector.broadcast %c2_i32_116 : i32 to vector<16x1xi32>
    %359 = arith.cmpi eq, %357, %358 : vector<16x1xi32>
    %c2_i32_117 = arith.constant 2 : i32
    %360 = vector.broadcast %c2_i32_117 : i32 to vector<16x1xi32>
    %361 = arith.cmpi sge, %0, %360 : vector<16x1xi32>
    %362 = arith.andi %359, %361 : vector<16x1xi1>
    %c16_i32_118 = arith.constant 16 : i32
    %363 = vector.broadcast %c16_i32_118 : i32 to vector<16x1xi32>
    %364 = arith.cmpi slt, %0, %363 : vector<16x1xi32>
    %365 = arith.andi %362, %364 : vector<16x1xi1>
    %cst_119 = arith.constant 0.000000e+00 : f32
    %366 = vector.shape_cast %365 : vector<16x1xi1> to vector<16x1xi1>
    %367 = vector.broadcast %366 : vector<16x1xi1> to vector<16x256xi1>
    %368 = vector.broadcast %cst_119 : f32 to vector<16x256xf32>
    %369 = arith.select %367, %4, %368 : vector<16x256xi1>, vector<16x256xf32>
    %cst_120 = arith.constant dense<0.000000e+00> : vector<256xf32>
    %370 = vector.multi_reduction <add>, %369, %cst_120 [0] : vector<16x256xf32> to vector<256xf32>
    %371 = vector.shape_cast %370 : vector<256xf32> to vector<1x256xf32>
    %cst_121 = arith.constant 2.500000e-01 : f32
    %372 = vector.broadcast %cst_121 : f32 to vector<1x256xf32>
    %373 = arith.mulf %371, %372 : vector<1x256xf32>
    %cst_122 = arith.constant 0xFF800000 : f32
    %374 = vector.shape_cast %365 : vector<16x1xi1> to vector<16x1xi1>
    %375 = vector.broadcast %374 : vector<16x1xi1> to vector<16x256xi1>
    %376 = vector.broadcast %cst_122 : f32 to vector<16x256xf32>
    %377 = arith.select %375, %4, %376 : vector<16x256xi1>, vector<16x256xf32>
    %cst_123 = arith.constant dense<0xFF800000> : vector<256xf32>
    %378 = vector.multi_reduction <maximumf>, %377, %cst_123 [0] : vector<16x256xf32> to vector<256xf32>
    %379 = vector.shape_cast %378 : vector<256xf32> to vector<1x256xf32>
    %380 = arith.addf %373, %379 : vector<1x256xf32>
    %381 = arith.negf %380 : vector<1x256xf32>
    %382 = math.exp %381 : vector<1x256xf32>
    %cst_124 = arith.constant 1.000000e+00 : f32
    %383 = vector.broadcast %cst_124 : f32 to vector<1x256xf32>
    %384 = arith.addf %383, %382 : vector<1x256xf32>
    %385 = arith.divf %383, %384 : vector<1x256xf32>
    %c4_i32_125 = arith.constant 4 : i32
    %c0_i32_126 = arith.constant 0 : i32
    %386 = arith.cmpi eq, %c4_i32_125, %c0_i32_126 : i32
    %c1_i32_127 = arith.constant 1 : i32
    %387 = arith.select %386, %c1_i32_127, %c4_i32_125 : i32
    %388 = vector.broadcast %387 : i32 to vector<16x1xi32>
    %389 = arith.remsi %0, %388 : vector<16x1xi32>
    %c0_i32_128 = arith.constant 0 : i32
    %390 = vector.broadcast %c0_i32_128 : i32 to vector<16x1xi32>
    %391 = arith.cmpi ne, %389, %390 : vector<16x1xi32>
    %c0_i32_129 = arith.constant 0 : i32
    %392 = vector.broadcast %c0_i32_129 : i32 to vector<16x1xi32>
    %393 = arith.cmpi slt, %389, %392 : vector<16x1xi32>
    %c0_i32_130 = arith.constant 0 : i32
    %394 = arith.cmpi slt, %387, %c0_i32_130 : i32
    %395 = vector.broadcast %394 : i1 to vector<16x1xi1>
    %396 = vector.broadcast %395 : vector<16x1xi1> to vector<16x1xi1>
    %397 = arith.xori %393, %396 : vector<16x1xi1>
    %398 = arith.andi %397, %391 : vector<16x1xi1>
    %399 = vector.broadcast %387 : i32 to vector<16x1xi32>
    %400 = arith.addi %389, %399 : vector<16x1xi32>
    %401 = arith.select %398, %400, %389 : vector<16x1xi1>, vector<16x1xi32>
    %c1_i32_131 = arith.constant 1 : i32
    %402 = vector.broadcast %c1_i32_131 : i32 to vector<16x1xi32>
    %403 = arith.cmpi eq, %401, %402 : vector<16x1xi32>
    %404 = vector.shape_cast %403 : vector<16x1xi1> to vector<16x1xi1>
    %405 = vector.broadcast %404 : vector<16x1xi1> to vector<16x256xi1>
    %406 = vector.shape_cast %385 : vector<1x256xf32> to vector<1x256xf32>
    %407 = vector.broadcast %406 : vector<1x256xf32> to vector<16x256xf32>
    %408 = arith.select %405, %407, %341 : vector<16x256xi1>, vector<16x256xf32>
    %c4_i32_132 = arith.constant 4 : i32
    %c0_i32_133 = arith.constant 0 : i32
    %409 = arith.cmpi eq, %c4_i32_132, %c0_i32_133 : i32
    %c1_i32_134 = arith.constant 1 : i32
    %410 = arith.select %409, %c1_i32_134, %c4_i32_132 : i32
    %411 = vector.broadcast %410 : i32 to vector<16x1xi32>
    %412 = arith.remsi %0, %411 : vector<16x1xi32>
    %c0_i32_135 = arith.constant 0 : i32
    %413 = vector.broadcast %c0_i32_135 : i32 to vector<16x1xi32>
    %414 = arith.cmpi ne, %412, %413 : vector<16x1xi32>
    %c0_i32_136 = arith.constant 0 : i32
    %415 = vector.broadcast %c0_i32_136 : i32 to vector<16x1xi32>
    %416 = arith.cmpi slt, %412, %415 : vector<16x1xi32>
    %c0_i32_137 = arith.constant 0 : i32
    %417 = arith.cmpi slt, %410, %c0_i32_137 : i32
    %418 = vector.broadcast %417 : i1 to vector<16x1xi1>
    %419 = vector.broadcast %418 : vector<16x1xi1> to vector<16x1xi1>
    %420 = arith.xori %416, %419 : vector<16x1xi1>
    %421 = arith.andi %420, %414 : vector<16x1xi1>
    %422 = vector.broadcast %410 : i32 to vector<16x1xi32>
    %423 = arith.addi %412, %422 : vector<16x1xi32>
    %424 = arith.select %421, %423, %412 : vector<16x1xi1>, vector<16x1xi32>
    %c3_i32_138 = arith.constant 3 : i32
    %425 = vector.broadcast %c3_i32_138 : i32 to vector<16x1xi32>
    %426 = arith.cmpi eq, %424, %425 : vector<16x1xi32>
    %c3_i32_139 = arith.constant 3 : i32
    %427 = vector.broadcast %c3_i32_139 : i32 to vector<16x1xi32>
    %428 = arith.cmpi sge, %0, %427 : vector<16x1xi32>
    %429 = arith.andi %426, %428 : vector<16x1xi1>
    %c16_i32_140 = arith.constant 16 : i32
    %430 = vector.broadcast %c16_i32_140 : i32 to vector<16x1xi32>
    %431 = arith.cmpi slt, %0, %430 : vector<16x1xi32>
    %432 = arith.andi %429, %431 : vector<16x1xi1>
    %cst_141 = arith.constant 0.000000e+00 : f32
    %433 = vector.shape_cast %432 : vector<16x1xi1> to vector<16x1xi1>
    %434 = vector.broadcast %433 : vector<16x1xi1> to vector<16x256xi1>
    %435 = vector.broadcast %cst_141 : f32 to vector<16x256xf32>
    %436 = arith.select %434, %4, %435 : vector<16x256xi1>, vector<16x256xf32>
    %cst_142 = arith.constant dense<0.000000e+00> : vector<256xf32>
    %437 = vector.multi_reduction <add>, %436, %cst_142 [0] : vector<16x256xf32> to vector<256xf32>
    %438 = vector.shape_cast %437 : vector<256xf32> to vector<1x256xf32>
    %cst_143 = arith.constant 2.500000e-01 : f32
    %439 = vector.broadcast %cst_143 : f32 to vector<1x256xf32>
    %440 = arith.mulf %438, %439 : vector<1x256xf32>
    %cst_144 = arith.constant 0xFF800000 : f32
    %441 = vector.shape_cast %432 : vector<16x1xi1> to vector<16x1xi1>
    %442 = vector.broadcast %441 : vector<16x1xi1> to vector<16x256xi1>
    %443 = vector.broadcast %cst_144 : f32 to vector<16x256xf32>
    %444 = arith.select %442, %4, %443 : vector<16x256xi1>, vector<16x256xf32>
    %cst_145 = arith.constant dense<0xFF800000> : vector<256xf32>
    %445 = vector.multi_reduction <maximumf>, %444, %cst_145 [0] : vector<16x256xf32> to vector<256xf32>
    %446 = vector.shape_cast %445 : vector<256xf32> to vector<1x256xf32>
    %447 = arith.addf %440, %446 : vector<1x256xf32>
    %448 = arith.negf %447 : vector<1x256xf32>
    %449 = math.exp %448 : vector<1x256xf32>
    %cst_146 = arith.constant 1.000000e+00 : f32
    %450 = vector.broadcast %cst_146 : f32 to vector<1x256xf32>
    %451 = arith.addf %450, %449 : vector<1x256xf32>
    %452 = arith.divf %450, %451 : vector<1x256xf32>
    %c4_i32_147 = arith.constant 4 : i32
    %c0_i32_148 = arith.constant 0 : i32
    %453 = arith.cmpi eq, %c4_i32_147, %c0_i32_148 : i32
    %c1_i32_149 = arith.constant 1 : i32
    %454 = arith.select %453, %c1_i32_149, %c4_i32_147 : i32
    %455 = vector.broadcast %454 : i32 to vector<16x1xi32>
    %456 = arith.remsi %0, %455 : vector<16x1xi32>
    %c0_i32_150 = arith.constant 0 : i32
    %457 = vector.broadcast %c0_i32_150 : i32 to vector<16x1xi32>
    %458 = arith.cmpi ne, %456, %457 : vector<16x1xi32>
    %c0_i32_151 = arith.constant 0 : i32
    %459 = vector.broadcast %c0_i32_151 : i32 to vector<16x1xi32>
    %460 = arith.cmpi slt, %456, %459 : vector<16x1xi32>
    %c0_i32_152 = arith.constant 0 : i32
    %461 = arith.cmpi slt, %454, %c0_i32_152 : i32
    %462 = vector.broadcast %461 : i1 to vector<16x1xi1>
    %463 = vector.broadcast %462 : vector<16x1xi1> to vector<16x1xi1>
    %464 = arith.xori %460, %463 : vector<16x1xi1>
    %465 = arith.andi %464, %458 : vector<16x1xi1>
    %466 = vector.broadcast %454 : i32 to vector<16x1xi32>
    %467 = arith.addi %456, %466 : vector<16x1xi32>
    %468 = arith.select %465, %467, %456 : vector<16x1xi1>, vector<16x1xi32>
    %c2_i32_153 = arith.constant 2 : i32
    %469 = vector.broadcast %c2_i32_153 : i32 to vector<16x1xi32>
    %470 = arith.cmpi eq, %468, %469 : vector<16x1xi32>
    %471 = vector.shape_cast %470 : vector<16x1xi1> to vector<16x1xi1>
    %472 = vector.broadcast %471 : vector<16x1xi1> to vector<16x256xi1>
    %473 = vector.shape_cast %452 : vector<1x256xf32> to vector<1x256xf32>
    %474 = vector.broadcast %473 : vector<1x256xf32> to vector<16x256xf32>
    %475 = arith.select %472, %474, %408 : vector<16x256xi1>, vector<16x256xf32>
    %c4_i32_154 = arith.constant 4 : i32
    %c0_i32_155 = arith.constant 0 : i32
    %476 = arith.cmpi eq, %c4_i32_154, %c0_i32_155 : i32
    %c1_i32_156 = arith.constant 1 : i32
    %477 = arith.select %476, %c1_i32_156, %c4_i32_154 : i32
    %478 = vector.broadcast %477 : i32 to vector<16x1xi32>
    %479 = arith.remsi %0, %478 : vector<16x1xi32>
    %c0_i32_157 = arith.constant 0 : i32
    %480 = vector.broadcast %c0_i32_157 : i32 to vector<16x1xi32>
    %481 = arith.cmpi ne, %479, %480 : vector<16x1xi32>
    %c0_i32_158 = arith.constant 0 : i32
    %482 = vector.broadcast %c0_i32_158 : i32 to vector<16x1xi32>
    %483 = arith.cmpi slt, %479, %482 : vector<16x1xi32>
    %c0_i32_159 = arith.constant 0 : i32
    %484 = arith.cmpi slt, %477, %c0_i32_159 : i32
    %485 = vector.broadcast %484 : i1 to vector<16x1xi1>
    %486 = vector.broadcast %485 : vector<16x1xi1> to vector<16x1xi1>
    %487 = arith.xori %483, %486 : vector<16x1xi1>
    %488 = arith.andi %487, %481 : vector<16x1xi1>
    %489 = vector.broadcast %477 : i32 to vector<16x1xi32>
    %490 = arith.addi %479, %489 : vector<16x1xi32>
    %491 = arith.select %488, %490, %479 : vector<16x1xi1>, vector<16x1xi32>
    %c0_i32_160 = arith.constant 0 : i32
    %492 = vector.broadcast %c0_i32_160 : i32 to vector<16x1xi32>
    %493 = arith.cmpi eq, %491, %492 : vector<16x1xi32>
    %c4_i32_161 = arith.constant 4 : i32
    %494 = vector.broadcast %c4_i32_161 : i32 to vector<16x1xi32>
    %495 = arith.cmpi sge, %0, %494 : vector<16x1xi32>
    %496 = arith.andi %493, %495 : vector<16x1xi1>
    %c16_i32_162 = arith.constant 16 : i32
    %497 = vector.broadcast %c16_i32_162 : i32 to vector<16x1xi32>
    %498 = arith.cmpi slt, %0, %497 : vector<16x1xi32>
    %499 = arith.andi %496, %498 : vector<16x1xi1>
    %cst_163 = arith.constant 0.000000e+00 : f32
    %500 = vector.shape_cast %499 : vector<16x1xi1> to vector<16x1xi1>
    %501 = vector.broadcast %500 : vector<16x1xi1> to vector<16x256xi1>
    %502 = vector.broadcast %cst_163 : f32 to vector<16x256xf32>
    %503 = arith.select %501, %4, %502 : vector<16x256xi1>, vector<16x256xf32>
    %cst_164 = arith.constant dense<0.000000e+00> : vector<256xf32>
    %504 = vector.multi_reduction <add>, %503, %cst_164 [0] : vector<16x256xf32> to vector<256xf32>
    %505 = vector.shape_cast %504 : vector<256xf32> to vector<1x256xf32>
    %cst_165 = arith.constant 0.333333343 : f32
    %506 = vector.broadcast %cst_165 : f32 to vector<1x256xf32>
    %507 = arith.mulf %505, %506 : vector<1x256xf32>
    %cst_166 = arith.constant 0xFF800000 : f32
    %508 = vector.shape_cast %499 : vector<16x1xi1> to vector<16x1xi1>
    %509 = vector.broadcast %508 : vector<16x1xi1> to vector<16x256xi1>
    %510 = vector.broadcast %cst_166 : f32 to vector<16x256xf32>
    %511 = arith.select %509, %4, %510 : vector<16x256xi1>, vector<16x256xf32>
    %cst_167 = arith.constant dense<0xFF800000> : vector<256xf32>
    %512 = vector.multi_reduction <maximumf>, %511, %cst_167 [0] : vector<16x256xf32> to vector<256xf32>
    %513 = vector.shape_cast %512 : vector<256xf32> to vector<1x256xf32>
    %514 = arith.addf %507, %513 : vector<1x256xf32>
    %515 = arith.negf %514 : vector<1x256xf32>
    %516 = math.exp %515 : vector<1x256xf32>
    %cst_168 = arith.constant 1.000000e+00 : f32
    %517 = vector.broadcast %cst_168 : f32 to vector<1x256xf32>
    %518 = arith.addf %517, %516 : vector<1x256xf32>
    %519 = arith.divf %517, %518 : vector<1x256xf32>
    %c4_i32_169 = arith.constant 4 : i32
    %c0_i32_170 = arith.constant 0 : i32
    %520 = arith.cmpi eq, %c4_i32_169, %c0_i32_170 : i32
    %c1_i32_171 = arith.constant 1 : i32
    %521 = arith.select %520, %c1_i32_171, %c4_i32_169 : i32
    %522 = vector.broadcast %521 : i32 to vector<16x1xi32>
    %523 = arith.remsi %0, %522 : vector<16x1xi32>
    %c0_i32_172 = arith.constant 0 : i32
    %524 = vector.broadcast %c0_i32_172 : i32 to vector<16x1xi32>
    %525 = arith.cmpi ne, %523, %524 : vector<16x1xi32>
    %c0_i32_173 = arith.constant 0 : i32
    %526 = vector.broadcast %c0_i32_173 : i32 to vector<16x1xi32>
    %527 = arith.cmpi slt, %523, %526 : vector<16x1xi32>
    %c0_i32_174 = arith.constant 0 : i32
    %528 = arith.cmpi slt, %521, %c0_i32_174 : i32
    %529 = vector.broadcast %528 : i1 to vector<16x1xi1>
    %530 = vector.broadcast %529 : vector<16x1xi1> to vector<16x1xi1>
    %531 = arith.xori %527, %530 : vector<16x1xi1>
    %532 = arith.andi %531, %525 : vector<16x1xi1>
    %533 = vector.broadcast %521 : i32 to vector<16x1xi32>
    %534 = arith.addi %523, %533 : vector<16x1xi32>
    %535 = arith.select %532, %534, %523 : vector<16x1xi1>, vector<16x1xi32>
    %c3_i32_175 = arith.constant 3 : i32
    %536 = vector.broadcast %c3_i32_175 : i32 to vector<16x1xi32>
    %537 = arith.cmpi eq, %535, %536 : vector<16x1xi32>
    %538 = vector.shape_cast %537 : vector<16x1xi1> to vector<16x1xi1>
    %539 = vector.broadcast %538 : vector<16x1xi1> to vector<16x256xi1>
    %540 = vector.shape_cast %519 : vector<1x256xf32> to vector<1x256xf32>
    %541 = vector.broadcast %540 : vector<1x256xf32> to vector<16x256xf32>
    %542 = arith.select %539, %541, %475 : vector<16x256xi1>, vector<16x256xf32>
    %543 = arith.mulf %273, %4 : vector<16x256xf32>
    %c0_176 = arith.constant 0 : index
    %c0_177 = arith.constant 0 : index
    %c0_178 = arith.constant 0 : index
    %544 = vector.load %arg4[%c0_176, %c0_177, %c0_178] : memref<1x32x256xf32, #tpu.memory_space<vmem>>, vector<1x16x256xf32>
    %545 = vector.shape_cast %544 : vector<1x16x256xf32> to vector<16x256xf32>
    %546 = vector.shape_cast %543 : vector<16x256xf32> to vector<1x16x256xf32>
    tpu.vector_store %arg4[%c0_176, %c0_177, %c0_178], %546 {strides = array<i32>} : memref<1x32x256xf32, #tpu.memory_space<vmem>>, vector<1x16x256xf32>,
    %547 = arith.mulf %542, %2 : vector<16x256xf32>
    %c0_179 = arith.constant 0 : index
    %c16 = arith.constant 16 : index
    %c0_180 = arith.constant 0 : index
    %548 = vector.load %arg4[%c0_179, %c16, %c0_180] : memref<1x32x256xf32, #tpu.memory_space<vmem>>, vector<1x16x256xf32>
    %549 = vector.shape_cast %548 : vector<1x16x256xf32> to vector<16x256xf32>
    %550 = vector.shape_cast %547 : vector<16x256xf32> to vector<1x16x256xf32>
    tpu.vector_store %arg4[%c0_179, %c16, %c0_180], %550 {strides = array<i32>} : memref<1x32x256xf32, #tpu.memory_space<vmem>>, vector<1x16x256xf32>,
    return
  }
  func.func @transform_0(%arg0: i32, %arg1: i32) -> (i32, i32, i32) {
    %c0_i32 = arith.constant 0 : i32
    %c0_i32_0 = arith.constant 0 : i32
    return %arg0, %c0_i32, %arg1 : i32, i32, i32
  }
  func.func @transform_1(%arg0: i32, %arg1: i32) -> (i32, i32, i32) {
    %c0_i32 = arith.constant 0 : i32
    %c0_i32_0 = arith.constant 0 : i32
    return %arg0, %c0_i32, %arg1 : i32, i32, i32
  }
  func.func @transform_2(%arg0: i32, %arg1: i32) -> (i32, i32, i32) {
    %c0_i32 = arith.constant 0 : i32
    %c0_i32_0 = arith.constant 0 : i32
    return %arg0, %c0_i32, %arg1 : i32, i32, i32
  }
}

</mosaic_0001>

<bundles_post_ra>
// kernel: tpu_custom_call.1
= control target key start
LH: loop header
LB: loop body
LE: loop exit
PB: predicated region body
PF: predicated region fallthrough
CT: control target
= control target key end

     0   :  { %7 = vsyncpa [#allocation3], 0  ;;  %s1912_s0 = inlined_call_operand.hbm [shape: f32[2,16,256], index: 0, kind: input, shape index: {}]   ;;  %s1913_s1 = inlined_call_operand.hbm [shape: f32[2,16,256], index: 1, kind: input, shape index: {}]   ;;  %s1914_s2 = inlined_call_operand.hbm [shape: f32[2,32,256], index: 2, kind: output, shape index: {}]  }
   0x1   :  { %9 = vsyncpa [#allocation3 + $0x1], 0 }
   0x2   :  { %10 = vsyncpa [#allocation6], 0 }
   0x3   :  { %12 = vsyncpa [#allocation6 + $0x1], 0 }
   0x4   :  { %13 = vsyncpa [#allocation4], 0 }
   0x5   :  { %15 = vsyncpa [#allocation4 + $0x1], 0  ;;  %s1258_s9 = smov 0   ;;  %s1260_s10 = smov 0  }
   0x6   :  { %s1262_s11 = smov 0   ;;  %s1264_s12 = smov 0  }
   0x7   :  { %s1266_s13 = smov 0   ;;  %s1268_s14 = smov 0  }
   0x8 LB: > { %s921_s15 = sadd.s32 4294967295, %s1234_s14   ;;  %s922_s16 = sadd.s32 4294967294, %s1234_s14   ;;  %s1234_s14 = sphi %s1268_s14, %s21_s14   ;;  %s1230_s13 = sphi %s1266_s13, %s1933_s13   ;;  %s1226_s12 = sphi %s1264_s12, %s1932_s12   ;;  %s1222_s11 = sphi %s1262_s11, %s1931_s11   ;;  %s1218_s10 = sphi %s1260_s10, %s1930_s10   ;;  %s1214_s9 = sphi %s1258_s9, %s1929_s9  }
   0x9   : > { %s33_s17 = sadd.s32 1, %s1230_s13  ;;  %s42_s18 = sadd.s32 1, %s1222_s11 }
   0xa   : > { %p35_p0 = scmp.ge.s32.totalorder %s33_s17, 2  ;;  %p49_p1 = scmp.ne.s32.totalorder %s1222_s11, %s1218_s10 }
   0xb   : > { %p50_p2 = scmp.eq.s32.totalorder %s1234_s14, 0  ;;  %p55_p3 = scmp.ne.s32.totalorder %s1218_s10, %s1214_s9 }
   0xc   : > { %s1935_s17 = smov (%p35_p0, %s33_s17), 0  ;;  %p56_p5 = scmp.eq.s32.totalorder %s921_s15, 0 }
   0xd   : > { %p1299_p4 = por %p50_p2, %p49_p1  ;;  %s37_s20 = ssub.s32 %s1230_s13, %s1935_s17 }
   0xe   : > { %p109_p6 = scmp.eq.s32.totalorder %s921_s15, 1  ;;  %p40_p7 = scmp.eq.s32.totalorder %s37_s20, 0 }
   0xf   : > { %p1305_p8 = por %p56_p5, %p55_p3  ;;  %p115_p10 = scmp.eq.s32.totalorder %s922_s16, 1 }
  0x10   : > { %p1309_p9 = por %p109_p6, %p49_p1  ;;  %p924_p12 = scmp.ge.s32.totalorder %s1234_s14, 2 }
  0x11   : > { %s1314_s23 = scalar_select %p40_p7, %s1222_s11, %s42_s18  }
  0x12   : > { %p1316_p11 = por %p115_p10, %p55_p3  ;;  %p976_p13 = scmp.lt.s32.totalorder %s1234_s14, 2 }
  0x13   : > { %s1323_s25 = sand.u32 1, %s1222_s11   ;;  %s956_s27 = sshll.u32 %s1230_s13, 9 }
  0x14   : > { %s925_s26 = sshll.u32 %s1323_s25, 5  ;;  %s147_s30 = scalar_lea.hbm %s1912_s0, %s956_s27 }
  0x15   : > { %s139_s3 = scalar_lea.vmem [#allocation2], %s925_s26  ;;  %p1336_p0 = pnand %p976_p13, %p1299_p4 }
  0x16   : > { %s148_s4 = sshll.u32 %s139_s3, 4  ;;  %p931_p1 = scmp.ge.s32.totalorder %s1234_s14, 1  ;;  %s149_s4 = int_to_ptr.vmem [resolvable:$true] %s148_s4 }
  0x17   : > { %s136_s6 = scalar_lea.sflag [#allocation3], %s1323_s25  ;;  %p1096_p2 = pneg %p1336_p0 }
  0x18   : > { %s1107_s7 = scalar_lea.vmem %s149_s4, 512  ;;  %s1236_s8 = smov [#allocation2]  }
  0x19   : > { %p1108_p3 = scmp.ne.s32.totalorder %s149_s4, %s1107_s7  ;;  %s1112_s15 = sshll.u32 %s1236_s8, 4  ;;  %s1113_s15 = int_to_ptr.vmem [resolvable:$false] %s1112_s15 }
  0x1a   : > { %s1114_s16 = scalar_lea.vmem %s1113_s15, 1024  ;;  %p1115_p4 = scmp.lt.s32.totalorder %s149_s4, %s1113_s15 }
  0x1b   : > { %p1110_p5 = pnand %p1108_p3, %p1096_p2  ;;  %p1116_p7 = scmp.lt.s32.totalorder %s1114_s16, %s1107_s7 }
  0x1d   : > { %p1111_p6 = pneg %p1110_p5  ;;  %p1117_p10 = por %p1116_p7, %p1115_p4 }
  0x1f   : > { %p1118_p13 = pnand %p1117_p10, %p1111_p6 }
  0x21   : > { %1121 = shalt.err (!%p1118_p13)
}
  0x22   : > { %s1237_s18 = smov 256   ;;  %s1238_s19 = smov 16  }
  0x23   : > { %968 = dma.hbm_to_vmem [thread:$0]  (!%p1336_p0), %s147_s30, 512, %s149_s4, %s136_s6, %s1237_s18, %s1237_s18, %s1238_s19  }
  0x24   : > { %p179_p3 = scmp.lt.s32.totalorder %s1234_s14, 3  ;;  %s170_s29 = scalar_lea.hbm %s1913_s1, %s956_s27 }
  0x25   : > { %s162_s7 = scalar_lea.vmem [#allocation5], %s925_s26  ;;  %s159_s15 = scalar_lea.sflag [#allocation6], %s1323_s25 }
  0x26   : > { %p1357_p5 = pnand %p931_p1, %p179_p3  ;;  %s171_s8 = sshll.u32 %s162_s7, 4  ;;  %s172_s8 = int_to_ptr.vmem [resolvable:$true] %s171_s8 }
  0x27   : > { %s1135_s16 = scalar_lea.vmem %s172_s8, 512  ;;  %s1239_s30 = smov [#allocation5]  }
  0x28   : > { %p1136_p6 = scmp.ne.s32.totalorder %s172_s8, %s1135_s16  ;;  %s1140_s4 = sshll.u32 %s1239_s30, 4  ;;  %s1141_s4 = int_to_ptr.vmem [resolvable:$false] %s1140_s4 }
  0x29   : > { %s1142_s27 = scalar_lea.vmem %s1141_s4, 1024  ;;  %p1143_p10 = scmp.lt.s32.totalorder %s172_s8, %s1141_s4 }
  0x2a   : > { %p1138_p4 = pnand %p1136_p6, %p1096_p2  ;;  %p1144_p1 = scmp.lt.s32.totalorder %s1142_s27, %s1135_s16 }
  0x2c   : > { %p1139_p7 = pneg %p1138_p4  ;;  %p1145_p13 = por %p1144_p1, %p1143_p10 }
  0x2e   : > { %p1146_p3 = pnand %p1145_p13, %p1139_p7 }
  0x30   : > { %1149 = shalt.err (!%p1146_p3)
}
  0x31   : > { %971 = dma.hbm_to_vmem [thread:$0]  (!%p1336_p0), %s170_s29, 512, %s172_s8, %s159_s15, %s1237_s18, %s1237_s18, %s1238_s19  }
  0x32   : > { %183 = sbr.rel (%p1357_p5) target bundleno = 220 (0xdc), region = 28  ;;  %s1372_s25 = sand.u32 (!%p1357_p5), 1, %s1218_s10  }
  0x33   : > { %s932_s26 = sshll.u32 (!%p1357_p5), %s1372_s25, 5  ;;  %s186_s6 = scalar_lea.sflag (!%p1357_p5), [#allocation3], %s1372_s25 }
  0x34   : > { %s189_s20 = scalar_lea.vmem (!%p1357_p5), [#allocation2], %s932_s26 }
  0x37   : > { %1201 = dma.done.wait (%p1305_p8), %s186_s6, 512  }
  0x38   : > { %1203 = vsyncadd (%p1305_p8), %s186_s6, 4294966784  ;;  %s195_s5 = scalar_lea.sflag [#allocation6], %s1372_s25  ;;  %s1381_s18 = scalar_lea.vmem [#allocation5], %s932_s26 }
  0x39   : > { %1205 = dma.done.wait (%p1305_p8), %s195_s5, 512  }
  0x3a   : > { %1207 = vsyncadd (%p1305_p8), %s195_s5, 4294966784  ;;  %v227_v0 = vlaneseq  ;;  %v1399_v5 = vld [vmem:[%s189_s20] sm:$0xff]  ;;  %v1401_v6 = vld [vmem:[%s189_s20 + $0x8] sm:$0xff]  ;;  %s934_s21 = sshll.u32 %s1372_s25, 6  ;;  %s958_s29 = sshll.u32 %s1226_s12, 10 }
  0x3b   : > { %v1403_v7 = vld [vmem:[%s189_s20 + $0x10] sm:$0xff]  ;;  %v1406_v8 = vld [vmem:[%s189_s20 + $0x18] sm:$0xff]  ;;  %s1768_s19 = scalar_lea.vmem [#allocation7], %s934_s21  ;;  %s1860_s8 = scalar_lea.hbm %s1914_s2, %s958_s29 }
  0x3c   : > { %v1387_v1 = vshrl.u32 %v227_v0, 7  ;;  %s808_s28 = sshll.u32 %s1768_s19, 4  ;;  %s793_s12 = scalar_lea.sflag [#allocation4], %s1372_s25  ;;  %s1851_s28 = int_to_ptr.vmem [resolvable:$true] %s808_s28 }
  0x3d   : > { %s1150_s15 = scalar_lea.vmem %s1851_s28, 1024  ;;  %s1240_s16 = smov [#allocation7]  }
  0x3e   : > { %v229_v2 = vadd.s32 8, %v1387_v1  ;;  %v1391_v3 = vand.u32 3, %v1387_v1  ;;  %vm264_vm0 = vcmp.ge.s32.totalorder %v1387_v1, 1  ;;  %vm340_vm3 = vcmp.ge.s32.totalorder %v1387_v1, 2  ;;  %p1151_p8 = scmp.ne.s32.totalorder %s1851_s28, %s1150_s15  ;;  %s1154_s30 = sshll.u32 %s1240_s16, 4  ;;  %s1155_s30 = int_to_ptr.vmem [resolvable:$false] %s1154_s30 }
  0x3f   : > { %vm412_vm4 = vcmp.ge.s32.totalorder %v1387_v1, 3  ;;  %vm482_vm13 = vcmp.ge.s32.totalorder %v1387_v1, 4  ;;  %s1156_s4 = scalar_lea.vmem %s1155_s30, 2048  ;;  %p1157_p5 = scmp.lt.s32.totalorder %s1851_s28, %s1155_s30 }
  0x40   : > { %v1394_v4 = vand.u32 3, %v229_v2  ;;  %vm262_vm1 = vcmp.eq.s32.totalorder %v1391_v3, 1  ;;  %vm338_vm2 = vcmp.eq.s32.totalorder %v1391_v3, 2  ;;  %vm410_vm8 = vcmp.eq.s32.totalorder %v1391_v3, 3  ;;  %p1152_p0 = pnand %p1151_p8, %p1309_p9  ;;  %p1158_p6 = scmp.lt.s32.totalorder %s1156_s4, %s1150_s15 }
  0x41   : > { %vm1411_vm6 = vmand %vm262_vm1, %vm264_vm0  ;;  %vm328_vm12 = vcmp.eq.s32.totalorder %v1391_v3, 0 }
  0x42   : > { %vm263_vm5 = vcmp.eq.s32.totalorder %v1394_v4, 1  ;;  %vm339_vm7 = vcmp.eq.s32.totalorder %v1394_v4, 2  ;;  %vm411_vm9 = vcmp.eq.s32.totalorder %v1394_v4, 3  ;;  %v276_v10 = vsel %vm1411_vm6, %v1399_v5, 0.0  ;;  %vm1434_vm10 = vmand %vm338_vm2, %vm340_vm3  ;;  %p1153_p2 = pneg %p1152_p0  ;;  %p1159_p4 = por %p1158_p6, %p1157_p5 }
  0x43   : > { %v277_v11 = vsel %vm1411_vm6, %v1401_v6, 0.0  ;;  %v278_v12 = vsel %vm263_vm5, %v1403_v7, 0.0  ;;  %v279_v13 = vsel %vm263_vm5, %v1406_v8, 0.0  ;;  %v296_v17 = vsel %vm1411_vm6, %v1399_v5, -inf  ;;  %vm1465_vm11 = vmand %vm410_vm8, %vm412_vm4 }
  0x44   : > { %v280_v15 = vadd.f32 %v278_v12, %v276_v10  ;;  %v1438_v16 = vadd.f32 %v279_v13, %v277_v11  ;;  %v297_v18 = vsel %vm1411_vm6, %v1401_v6, -inf  ;;  %v298_v19 = vsel %vm263_vm5, %v1403_v7, -inf  ;;  %vm1509_vm15 = vmand %vm328_vm12, %vm482_vm13  ;;  %p1160_p7 = pnand %p1159_p4, %p1153_p2 }
  0x45   : > { %v350_v20 = vsel %vm1434_vm10, %v1399_v5, 0.0  ;;  %v351_v21 = vsel %vm1434_vm10, %v1401_v6, 0.0  ;;  %v352_v22 = vsel %vm339_vm7, %v1403_v7, 0.0  ;;  %v300_v24 = vmax.f32 %v296_v17, %v298_v19 }
  0x46   : > { %v281_v23 = vrot.slane %v280_v15, 4  ;;  %v353_v25 = vsel %vm339_vm7, %v1406_v8, 0.0  ;;  %v354_v26 = vadd.f32 %v352_v22, %v350_v20  ;;  %v370_v29 = vsel %vm1434_vm10, %v1399_v5, -inf }
  0x47   : > { %v361_v28 = vadd.f32 %v353_v25, %v351_v21  ;;  %v371_v30 = vsel %vm1434_vm10, %v1401_v6, -inf  ;;  %v372_v31 = vsel %vm339_vm7, %v1403_v7, -inf  ;;  %v301_v33 = vrot.slane %v300_v24, 4 }
  0x48   : > { %v282_v32 = vadd.f32 %v281_v23, %v280_v15  ;;  %v355_v34 = vrot.slane %v354_v26, 4  ;;  %v373_v35 = vsel %vm339_vm7, %v1406_v8, -inf  ;;  %v374_v37 = vmax.f32 %v370_v29, %v372_v31 }
  0x49   : > { %v362_v36 = vrot.slane %v361_v28, 4  ;;  %v381_v38 = vmax.f32 %v371_v30, %v373_v35  ;;  %v422_v39 = vsel %vm1465_vm11, %v1399_v5, 0.0  ;;  %v302_v41 = vmax.f32 %v300_v24, %v301_v33 }
  0x4a   : > { %v283_v40 = vrot.slane %v282_v32, 2  ;;  %v356_v42 = vadd.f32 %v355_v34, %v354_v26  ;;  %v423_v43 = vsel %vm1465_vm11, %v1401_v6, 0.0  ;;  %v375_v45 = vrot.slane %v374_v37, 4 }
  0x4b   : > { %v363_v44 = vadd.f32 %v362_v36, %v361_v28  ;;  %v382_v46 = vrot.slane %v381_v38, 4  ;;  %v424_v47 = vsel %vm411_vm9, %v1403_v7, 0.0  ;;  %v303_v49 = vrot.slane %v302_v41, 2 }
  0x4c   : > { %v284_v48 = vadd.f32 %v283_v40, %v282_v32  ;;  %v357_v50 = vrot.slane %v356_v42, 2  ;;  %v425_v51 = vsel %vm411_vm9, %v1406_v8, 0.0  ;;  %v376_v53 = vmax.f32 %v374_v37, %v375_v45 }
  0x4d   : > { %v364_v52 = vrot.slane %v363_v44, 2  ;;  %v383_v54 = vmax.f32 %v381_v38, %v382_v46  ;;  %v426_v55 = vadd.f32 %v424_v47, %v422_v39  ;;  %v304_v57 = vmax.f32 %v302_v41, %v303_v49 }
  0x4e   : > { %v285_v56 = vrot.slane %v284_v48, 1  ;;  %v358_v58 = vadd.f32 %v357_v50, %v356_v42  ;;  %v433_v59 = vadd.f32 %v425_v51, %v423_v43  ;;  %v377_v61 = vrot.slane %v376_v53, 2 }
  0x4f   : > { %v365_v60 = vadd.f32 %v364_v52, %v363_v44  ;;  %v384_v62 = vrot.slane %v383_v54, 2  ;;  %v427_v63 = vrot.slane %v426_v55, 4  ;;  %v305_v2 = vrot.slane %v304_v57, 1 }
  0x50   : > { %v286_v0 = vadd.f32 %v285_v56, %v284_v48  ;;  %vm329_vm14 = vcmp.eq.s32.totalorder %v1394_v4, 0  ;;  %v359_v10 = vrot.slane %v358_v58, 1  ;;  %v434_v11 = vrot.slane %v433_v59, 4 }
  0x51   : > { %v366_v12 = vrot.slane %v365_v60, 1  ;;  %v378_v13 = vmax.f32 %v376_v53, %v377_v61  ;;  %v385_v15 = vmax.f32 %v383_v54, %v384_v62  ;;  %v428_v17 = vadd.f32 %v427_v63, %v426_v55 }
  0x52   : > { %v294_v19 = vmul.f32 0.25, %v286_v0  ;;  %v306_v20 = vmax.f32 %v304_v57, %v305_v2  ;;  %v360_v21 = vadd.f32 %v359_v10, %v358_v58  ;;  %v435_v22 = vadd.f32 %v434_v11, %v433_v59  ;;  %v1531_v58 = vld [vmem:[%s1381_s18] sm:$0xff] }
  0x53   : > { %v367_v23 = vadd.f32 %v366_v12, %v365_v60  ;;  %v379_v24 = vrot.slane %v378_v13, 1  ;;  %v386_v25 = vrot.slane %v385_v15, 1  ;;  %v429_v26 = vrot.slane %v428_v17, 2 }
  0x54   : > { %v314_v28 = vadd.f32 %v306_v20, %v294_v19  ;;  %v368_v29 = vmul.f32 0.25, %v360_v21  ;;  %v436_v30 = vrot.slane %v435_v22, 2  ;;  %v442_v31 = vsel %vm1465_vm11, %v1399_v5, -inf }
  0x55   : > { %v369_v32 = vmul.f32 0.25, %v367_v23  ;;  %v380_v33 = vmax.f32 %v378_v13, %v379_v24  ;;  %v387_v34 = vmax.f32 %v385_v15, %v386_v25  ;;  %v430_v35 = vadd.f32 %v429_v26, %v428_v17 }
  0x56   : > { %v935_v36 = vmul.f32 -1.442695, %v314_v28  ;;  %v437_v37 = vadd.f32 %v436_v30, %v435_v22  ;;  %v443_v38 = vsel %vm1465_vm11, %v1401_v6, -inf  ;;  %v444_v39 = vsel %vm411_vm9, %v1403_v7, -inf }
  0x57   : > { %v388_v41 = vadd.f32 %v380_v33, %v368_v29  ;;  %v389_v42 = vadd.f32 %v387_v34, %v369_v32  ;;  %v431_v43 = vrot.slane %v430_v35, 1  ;;  %v445_v44 = vsel %vm411_vm9, %v1406_v8, -inf }
  0x58   : > { %1030 = vpow2.f32 %v935_v36  ;;  %v438_v45 = vrot.slane %v437_v37, 1  ;;  %v446_v46 = vmax.f32 %v442_v31, %v444_v39  ;;  %v453_v47 = vmax.f32 %v443_v38, %v445_v44 }
  0x59   : > { %v937_v48 = vmul.f32 -1.442695, %v388_v41  ;;  %v1516_v1 = vmul.f32 -1.442695, %v389_v42  ;;  %v432_v49 = vadd.f32 %v431_v43, %v430_v35  ;;  %v492_v50 = vsel %vm1509_vm15, %v1399_v5, 0.0 }
  0x5a   : > { %v439_v51 = vadd.f32 %v438_v45, %v437_v37  ;;  %v447_v52 = vrot.slane %v446_v46, 4  ;;  %v454_v53 = vrot.slane %v453_v47, 4  ;;  %v493_v54 = vsel %vm1509_vm15, %v1401_v6, 0.0 }
  0x5b   : > { %1032 = vpow2.f32 %v937_v48  ;;  %v440_v55 = vmul.f32 0.25, %v432_v49  ;;  %v494_v56 = vsel %vm329_vm14, %v1403_v7, 0.0  ;;  %v495_v57 = vsel %vm329_vm14, %v1406_v8, 0.0 }
  0x5c   : > { %v441_v59 = vmul.f32 0.25, %v439_v51  ;;  %v448_v60 = vmax.f32 %v446_v46, %v447_v52  ;;  %v455_v61 = vmax.f32 %v453_v47, %v454_v53  ;;  %v496_v62 = vadd.f32 %v494_v56, %v492_v50 }
  0x5d   : > { %v503_v63 = vadd.f32 %v495_v57, %v493_v54  ;;  %v512_v0 = vsel %vm1509_vm15, %v1399_v5, -inf  ;;  %v513_v2 = vsel %vm1509_vm15, %v1401_v6, -inf  ;;  %v514_v10 = vsel %vm329_vm14, %v1403_v7, -inf }
  0x5e   : > { %v449_v11 = vrot.slane %v448_v60, 2  ;;  %v456_v12 = vrot.slane %v455_v61, 2  ;;  %v497_v13 = vrot.slane %v496_v62, 4  ;;  %v515_v15 = vsel %vm329_vm14, %v1406_v8, -inf }
  0x5f   : > { %v504_v17 = vrot.slane %v503_v63, 4  ;;  %v516_v19 = vmax.f32 %v512_v0, %v514_v10  ;;  %v523_v20 = vmax.f32 %v513_v2, %v515_v15  ;;  %v552_v21 = vsel %vm1411_vm6, %v1531_v58, 0.0  ;;  %v1571_v10 = vld [vmem:[%s1381_s18 + $0x8] sm:$0xff] }
  0x60   : > { %v450_v22 = vmax.f32 %v448_v60, %v449_v11  ;;  %v457_v23 = vmax.f32 %v455_v61, %v456_v12  ;;  %v498_v24 = vadd.f32 %v497_v13, %v496_v62  ;;  %v572_v25 = vsel %vm1411_vm6, %v1531_v58, -inf }
  0x61   : > { %v505_v26 = vadd.f32 %v504_v17, %v503_v63  ;;  %v517_v28 = vrot.slane %v516_v19, 4  ;;  %v524_v29 = vrot.slane %v523_v20, 4  ;;  %v608_v30 = vsel %vm1434_vm10, %v1531_v58, 0.0 }
  0x62   : > { %v451_v31 = vrot.slane %v450_v22, 1  ;;  %v458_v32 = vrot.slane %v457_v23, 1  ;;  %v499_v33 = vrot.slane %v498_v24, 2  ;;  %v628_v34 = vsel %vm1434_vm10, %v1531_v58, -inf }
  0x63   : > { %v506_v35 = vrot.slane %v505_v26, 2  ;;  %v518_v36 = vmax.f32 %v516_v19, %v517_v28  ;;  %v525_v37 = vmax.f32 %v523_v20, %v524_v29  ;;  %v664_v38 = vsel %vm1465_vm11, %v1531_v58, 0.0  ;;  %v1586_v28 = vld [vmem:[%s1381_s18 + $0x10] sm:$0xff] }
  0x64   : > { %v452_v39 = vmax.f32 %v450_v22, %v451_v31  ;;  %v459_v41 = vmax.f32 %v457_v23, %v458_v32  ;;  %v500_v42 = vadd.f32 %v499_v33, %v498_v24  ;;  %v684_v43 = vsel %vm1465_vm11, %v1531_v58, -inf }
  0x65   : > { %v1031_v44 = vpop.eup %1030  ;;  %v507_v45 = vadd.f32 %v506_v35, %v505_v26  ;;  %v519_v46 = vrot.slane %v518_v36, 2  ;;  %v526_v47 = vrot.slane %v525_v37, 2  ;;  %v720_v48 = vsel %vm1509_vm15, %v1531_v58, 0.0 }
  0x66   : > { %v322_v49 = vadd.f32 1.0, %v1031_v44  ;;  %v460_v50 = vadd.f32 %v452_v39, %v440_v55  ;;  %v461_v51 = vadd.f32 %v459_v41, %v441_v59  ;;  %v501_v52 = vrot.slane %v500_v42, 1 }
  0x67   : > { %v520_v53 = vmax.f32 %v518_v36, %v519_v46  ;;  %v527_v54 = vmax.f32 %v525_v37, %v526_v47  ;;  %v740_v56 = vsel %vm1509_vm15, %v1531_v58, -inf  ;;  %v288_v57 = vrot.slane %v1438_v16, 4 }
  0x68   : > { %v1033_v60 = vpop.eup %1032  ;;  %1034 = vrcp.f32 %v322_v49  ;;  %v939_v61 = vmul.f32 -1.442695, %v460_v50  ;;  %v940_v62 = vmul.f32 -1.442695, %v461_v51  ;;  %v502_v63 = vadd.f32 %v501_v52, %v500_v42 }
  0x69   : > { %v396_v0 = vadd.f32 1.0, %v1033_v60  ;;  %v521_v2 = vrot.slane %v520_v53, 1  ;;  %v289_v55 = vadd.f32 %v288_v57, %v1438_v16  ;;  %v299_v59 = vsel %vm263_vm5, %v1406_v8, -inf }
  0x6a   : > { %1036 = vpow2.f32 %v939_v61  ;;  %v510_v11 = vmul.f32 0.33333334, %v502_v63  ;;  %v307_v12 = vmax.f32 %v297_v18, %v299_v59  ;;  %v508_v13 = vrot.slane %v507_v45, 1 }
  0x6b   : > { %1038 = vrcp.f32 %v396_v0  ;;  %v522_v15 = vmax.f32 %v520_v53, %v521_v2  ;;  %v290_v17 = vrot.slane %v289_v55, 2  ;;  %v528_v19 = vrot.slane %v527_v54, 1 }
  0x6c   : > { %v308_v20 = vrot.slane %v307_v12, 4  ;;  %1040 = vpow2.f32 %v1516_v1  ;;  %v509_v16 = vadd.f32 %v508_v13, %v507_v45  ;;  %v609_v22 = vsel %vm1434_vm10, %v1571_v10, 0.0 }
  0x6d   : > { %v530_v23 = vadd.f32 %v522_v15, %v510_v11  ;;  %v291_v24 = vadd.f32 %v290_v17, %v289_v55  ;;  %1042 = vpow2.f32 %v940_v62  ;;  %v529_v26 = vmax.f32 %v527_v54, %v528_v19 }
  0x6e   : > { %v309_v18 = vmax.f32 %v307_v12, %v308_v20  ;;  %v511_v29 = vmul.f32 0.33333334, %v509_v16  ;;  %v629_v31 = vsel %vm1434_vm10, %v1571_v10, -inf  ;;  %v665_v1 = vsel %vm1465_vm11, %v1571_v10, 0.0 }
  0x6f   : > { %v941_v32 = vmul.f32 -1.442695, %v530_v23  ;;  %v292_v33 = vrot.slane %v291_v24, 1  ;;  %v685_v35 = vsel %vm1465_vm11, %v1571_v10, -inf  ;;  %v721_v36 = vsel %vm1509_vm15, %v1571_v10, 0.0 }
  0x70   : > { %v310_v37 = vrot.slane %v309_v18, 2  ;;  %v531_v39 = vadd.f32 %v529_v26, %v511_v29  ;;  %v741_v41 = vsel %vm1509_vm15, %v1571_v10, -inf  ;;  %v610_v42 = vsel %vm339_vm7, %v1586_v28, 0.0 }
  0x71   : > { %1044 = vpow2.f32 %v941_v32  ;;  %v293_v44 = vadd.f32 %v292_v33, %v291_v24  ;;  %v612_v45 = vadd.f32 %v610_v42, %v608_v30  ;;  %v630_v46 = vsel %vm339_vm7, %v1586_v28, -inf  ;;  %v1665_v33 = vld [vmem:[%s1381_s18 + $0x18] sm:$0xff] }
  0x72   : > { %v311_v47 = vmax.f32 %v309_v18, %v310_v37  ;;  %v942_v49 = vmul.f32 -1.442695, %v531_v39  ;;  %v632_v50 = vmax.f32 %v628_v34, %v630_v46  ;;  %v666_v51 = vsel %vm411_vm9, %v1586_v28, 0.0 }
  0x73   : > { %v295_v52 = vmul.f32 0.25, %v293_v44  ;;  %v613_v53 = vrot.slane %v612_v45, 4  ;;  %v668_v30 = vadd.f32 %v666_v51, %v664_v38  ;;  %v686_v54 = vsel %vm411_vm9, %v1586_v28, -inf }
  0x74   : > { %v312_v57 = vrot.slane %v311_v47, 1  ;;  %1046 = vpow2.f32 %v942_v49  ;;  %v633_v60 = vrot.slane %v632_v50, 4  ;;  %v688_v34 = vmax.f32 %v684_v43, %v686_v54 }
  0x75   : > { %v1035_v61 = vpop.eup %1034  ;;  %v614_v62 = vadd.f32 %v613_v53, %v612_v45  ;;  %v669_v63 = vrot.slane %v668_v30, 4  ;;  %v722_v0 = vsel %vm329_vm14, %v1586_v28, 0.0  ;;  %v742_v38 = vsel %vm329_vm14, %v1586_v28, -inf }
  0x76   : > { %v334_v2 = vsel %vm328_vm12, %v1035_v61, 0.0  ;;  %v313_v55 = vmax.f32 %v311_v47, %v312_v57  ;;  %v336_v59 = vsel %vm329_vm14, %v1035_v61, 0.0  ;;  %v634_v11 = vmax.f32 %v632_v50, %v633_v60 }
  0x77   : > { %v1037_v43 = vpop.eup %1036  ;;  %v615_v12 = vrot.slane %v614_v62, 2  ;;  %v1641_v13 = vadd.f32 %v669_v63, %v668_v30  ;;  %v689_v15 = vrot.slane %v688_v34, 4  ;;  %v724_v17 = vadd.f32 %v722_v0, %v720_v48 }
  0x78   : > { %v1039_v19 = vpop.eup %1038  ;;  %v468_v20 = vadd.f32 1.0, %v1037_v43  ;;  %v315_v16 = vadd.f32 %v313_v55, %v295_v52  ;;  %v635_v23 = vrot.slane %v634_v11, 2  ;;  %v1651_v24 = vmax.f32 %v740_v56, %v742_v38 }
  0x79   : > { %v1041_v26 = vpop.eup %1040  ;;  %v1655_v18 = vsel %vm262_vm1, %v1039_v19, %v334_v2  ;;  %v1659_v29 = vsel %vm263_vm5, %v1039_v19, %v336_v59  ;;  %v1661_v48 = vadd.f32 %v615_v12, %v614_v62  ;;  %v671_v32 = vrot.slane %v1641_v13, 2 }
  0x7a   : > { %v1043_v37 = vpop.eup %1042  ;;  %1048 = vrcp.f32 %v468_v20  ;;  %v936_v39 = vmul.f32 -1.442695, %v315_v16  ;;  %v397_v56 = vadd.f32 1.0, %v1041_v26  ;;  %v636_v42 = vmax.f32 %v634_v11, %v635_v23 }
  0x7b   : > { %v469_v44 = vadd.f32 1.0, %v1043_v37  ;;  %v690_v45 = vmax.f32 %v688_v34, %v689_v15  ;;  %v725_v46 = vrot.slane %v724_v17, 4  ;;  %v745_v47 = vrot.slane %v1651_v24, 4 }
  0x7c   : > { %1050 = vpow2.f32 %v936_v39  ;;  %v611_v49 = vsel %vm339_vm7, %v1665_v33, 0.0  ;;  %v631_v50 = vsel %vm339_vm7, %v1665_v33, -inf  ;;  %v667_v51 = vsel %vm411_vm9, %v1665_v33, 0.0 }
  0x7d   : > { %1052 = vrcp.f32 %v397_v56  ;;  %v691_v52 = vrot.slane %v690_v45, 2  ;;  %v726_v53 = vadd.f32 %v725_v46, %v724_v17  ;;  %v619_v30 = vadd.f32 %v611_v49, %v609_v22 }
  0x7e   : > { %v1045_v54 = vpop.eup %1044  ;;  %1054 = vrcp.f32 %v469_v44  ;;  %v639_v57 = vmax.f32 %v629_v31, %v631_v50  ;;  %v675_v60 = vadd.f32 %v667_v51, %v665_v1  ;;  %v687_v34 = vsel %vm411_vm9, %v1665_v33, -inf }
  0x7f   : > { %v538_v61 = vadd.f32 1.0, %v1045_v54  ;;  %v620_v62 = vrot.slane %v619_v30, 4  ;;  %v695_v22 = vmax.f32 %v685_v35, %v687_v34  ;;  %v723_v14 = vsel %vm329_vm14, %v1665_v33, 0.0 }
  0x80   : > { %v640_v31 = vrot.slane %v639_v57, 4  ;;  %v676_v63 = vrot.slane %v675_v60, 4  ;;  %v731_v1 = vadd.f32 %v723_v14, %v721_v36  ;;  %v743_v0 = vsel %vm329_vm14, %v1665_v33, -inf }
  0x81   : > { %v1047_v38 = vpop.eup %1046  ;;  %1056 = vrcp.f32 %v538_v61  ;;  %v621_v27 = vadd.f32 %v620_v62, %v619_v30  ;;  %v696_v2 = vrot.slane %v695_v22, 4  ;;  %v1710_v35 = vmax.f32 %v741_v41, %v743_v0 }
  0x82   : > { %v539_v55 = vadd.f32 1.0, %v1047_v38  ;;  %v641_v59 = vmax.f32 %v639_v57, %v640_v31  ;;  %v1712_v11 = vadd.f32 %v676_v63, %v675_v60  ;;  %v732_v43 = vrot.slane %v731_v1, 4 }
  0x83   : > { %v622_v36 = vrot.slane %v621_v27, 2  ;;  %v1714_v12 = vmax.f32 %v695_v22, %v696_v2  ;;  %v752_v15 = vrot.slane %v1710_v35, 4  ;;  %v554_v17 = vsel %vm263_vm5, %v1586_v28, 0.0 }
  0x84   : > { %1058 = vrcp.f32 %v539_v55  ;;  %v642_v40 = vrot.slane %v641_v59, 2  ;;  %v678_v19 = vrot.slane %v1712_v11, 2  ;;  %v1721_v41 = vadd.f32 %v732_v43, %v731_v1 }
  0x85   : > { %v1723_v20 = vadd.f32 %v622_v36, %v621_v27  ;;  %v698_v16 = vrot.slane %v1714_v12, 2  ;;  %v556_v23 = vadd.f32 %v554_v17, %v552_v21  ;;  %v574_v26 = vsel %vm263_vm5, %v1586_v28, -inf }
  0x86   : > { %v1733_v37 = vmax.f32 %v641_v59, %v642_v40  ;;  %v576_v39 = vmax.f32 %v572_v25, %v574_v26  ;;  %v617_v56 = vrot.slane %v1661_v48, 1  ;;  %v637_v44 = vrot.slane %v636_v42, 1 }
  0x87   : > { %v1049_v46 = vpop.eup %1048  ;;  %v557_v49 = vrot.slane %v556_v23, 4  ;;  %v672_v50 = vadd.f32 %v671_v32, %v1641_v13  ;;  %v692_v51 = vmax.f32 %v690_v45, %v691_v52  ;;  %v727_v21 = vrot.slane %v726_v53, 2 }
  0x88   : > { %v478_v30 = vsel %vm338_vm2, %v1049_v46, %v1655_v18  ;;  %v480_v54 = vsel %vm339_vm7, %v1049_v46, %v1659_v29  ;;  %v577_v57 = vrot.slane %v576_v39, 4  ;;  %v618_v25 = vadd.f32 %v617_v56, %v1661_v48 }
  0x89   : > { %v1051_v60 = vpop.eup %1050  ;;  %v558_v34 = vadd.f32 %v557_v49, %v556_v23  ;;  %v638_v61 = vmax.f32 %v636_v42, %v637_v44  ;;  %v673_v62 = vrot.slane %v672_v50, 1  ;;  %v693_v22 = vrot.slane %v692_v51, 1 }
  0x8a   : > { %v1748_v13 = vpop.eup %1052  ;;  %v323_v32 = vadd.f32 1.0, %v1051_v60  ;;  %v578_v45 = vmax.f32 %v576_v39, %v577_v57  ;;  %v626_v52 = vmul.f32 0.25, %v618_v25  ;;  %v728_v14 = vadd.f32 %v727_v21, %v726_v53 }
  0x8b   : > { %v1750_v18 = vpop.eup %1054  ;;  %v559_v31 = vrot.slane %v558_v34, 2  ;;  %v674_v63 = vadd.f32 %v673_v62, %v672_v50  ;;  %v694_v29 = vmax.f32 %v692_v51, %v693_v22  ;;  %v746_v48 = vmax.f32 %v1651_v24, %v745_v47 }
  0x8c   : > { %1060 = vrcp.f32 %v323_v32  ;;  %v579_v42 = vrot.slane %v578_v45, 2  ;;  %v646_v1 = vadd.f32 %v638_v61, %v626_v52  ;;  %v729_v0 = vrot.slane %v728_v14, 1 }
  0x8d   : > { %v560_v38 = vadd.f32 %v559_v31, %v558_v34  ;;  %v682_v27 = vmul.f32 0.25, %v674_v63  ;;  %v747_v2 = vrot.slane %v746_v48, 2  ;;  %v553_v53 = vsel %vm1411_vm6, %v1571_v10, 0.0 }
  0x8e   : > { %v1057_v55 = vpop.eup %1056  ;;  %v580_v59 = vmax.f32 %v578_v45, %v579_v42  ;;  %v945_v43 = vmul.f32 -1.442695, %v646_v1  ;;  %v730_v36 = vadd.f32 %v729_v0, %v728_v14  ;;  %v555_v24 = vsel %vm263_vm5, %v1665_v33, 0.0 }
  0x8f   : > { %v548_v47 = vsel %vm410_vm8, %v1057_v55, %v478_v30  ;;  %v550_v17 = vsel %vm411_vm9, %v1057_v55, %v480_v54  ;;  %v561_v40 = vrot.slane %v560_v38, 1  ;;  %v702_v23 = vadd.f32 %v694_v29, %v682_v27 }
  0x90   : > { %v776_v26 = vmul.f32 %v548_v47, %v1531_v58  ;;  %v778_v39 = vmul.f32 %v550_v17, %v1586_v28  ;;  %v581_v56 = vrot.slane %v580_v59, 1  ;;  %1062 = vpow2.f32 %v945_v43 }
  0x91   : > { %v1059_v44 = vpop.eup %1058  ;;  %v562_v46 = vadd.f32 %v561_v40, %v560_v38  ;;  %v947_v49 = vmul.f32 -1.442695, %v702_v23  ;;  %v738_v50 = vmul.f32 0.33333334, %v730_v36  ;;  %v748_v51 = vmax.f32 %v746_v48, %v747_v2 }
  0x92   : > { %780 = vst [vmem:[%s1768_s19] sm:$0xff] %v776_v26  ;;  %782 = vst [vmem:[%s1768_s19 + $0x10] sm:$0xff] %v778_v39  ;;  %v582_v21 = vmax.f32 %v580_v59, %v581_v56  ;;  %v563_v30 = vadd.f32 %v555_v24, %v553_v53  ;;  %v573_v58 = vsel %vm1411_vm6, %v1571_v10, -inf  ;;  %v575_v28 = vsel %vm263_vm5, %v1665_v33, -inf }
  0x93   : > { %v570_v54 = vmul.f32 0.25, %v562_v46  ;;  %1064 = vpow2.f32 %v947_v49  ;;  %v749_v57 = vrot.slane %v748_v51, 1  ;;  %v583_v25 = vmax.f32 %v573_v58, %v575_v28 }
  0x94   : > { %v564_v60 = vrot.slane %v563_v30, 4  ;;  %v624_v34 = vrot.slane %v1723_v20, 1  ;;  %v644_v61 = vrot.slane %v1733_v37, 1  ;;  %v679_v62 = vadd.f32 %v678_v19, %v1712_v11 }
  0x95   : > { %v590_v22 = vadd.f32 %v582_v21, %v570_v54  ;;  %v750_v9 = vmax.f32 %v748_v51, %v749_v57  ;;  %v584_v32 = vrot.slane %v583_v25, 4  ;;  %v699_v45 = vmax.f32 %v1714_v12, %v698_v16 }
  0x96   : > { %v565_v52 = vadd.f32 %v564_v60, %v563_v30  ;;  %v625_v14 = vadd.f32 %v624_v34, %v1723_v20  ;;  %v645_v31 = vmax.f32 %v1733_v37, %v644_v61  ;;  %v680_v63 = vrot.slane %v679_v62, 1 }
  0x97   : > { %v943_v29 = vmul.f32 -1.442695, %v590_v22  ;;  %v758_v48 = vadd.f32 %v750_v9, %v738_v50  ;;  %v585_v42 = vmax.f32 %v583_v25, %v584_v32  ;;  %v700_v1 = vrot.slane %v699_v45, 1 }
  0x98   : > { %v566_v0 = vrot.slane %v565_v52, 2  ;;  %v627_v38 = vmul.f32 0.25, %v625_v14  ;;  %v681_v11 = vadd.f32 %v680_v63, %v679_v62  ;;  %v734_v19 = vrot.slane %v1721_v41, 2 }
  0x99   : > { %v1061_v27 = vpop.eup %1060  ;;  %1066 = vpow2.f32 %v943_v29  ;;  %v949_v2 = vmul.f32 -1.442695, %v758_v48  ;;  %v586_v53 = vrot.slane %v585_v42, 2  ;;  %v701_v12 = vmax.f32 %v699_v45, %v700_v1 }
  0x9a   : > { %v335_v20 = vsel %vm328_vm12, %v1061_v27, 0.0  ;;  %v337_v16 = vsel %vm329_vm14, %v1061_v27, 0.0  ;;  %v567_v37 = vadd.f32 %v566_v0, %v565_v52  ;;  %v647_v55 = vadd.f32 %v645_v31, %v627_v38 }
  0x9b   : > { %v407_v59 = vsel %vm262_vm1, %v1748_v13, %v335_v20  ;;  %v409_v43 = vsel %vm263_vm5, %v1748_v13, %v337_v16  ;;  %1068 = vpow2.f32 %v949_v2  ;;  %v587_v36 = vmax.f32 %v585_v42, %v586_v53 }
  0x9c   : > { %v479_v24 = vsel %vm338_vm2, %v1750_v18, %v407_v59  ;;  %v481_v47 = vsel %vm339_vm7, %v1750_v18, %v409_v43  ;;  %v568_v17 = vrot.slane %v567_v37, 1  ;;  %v946_v40 = vmul.f32 -1.442695, %v647_v55 }
  0x9d   : > { %v1063_v23 = vpop.eup %1062  ;;  %v549_v26 = vsel %vm410_vm8, %v1059_v44, %v479_v24  ;;  %v551_v13 = vsel %vm411_vm9, %v1059_v44, %v481_v47  ;;  %v588_v39 = vrot.slane %v587_v36, 1  ;;  %v683_v56 = vmul.f32 0.25, %v681_v11 }
  0x9e   : > { %v777_v46 = vmul.f32 %v549_v26, %v1571_v10  ;;  %v779_v49 = vmul.f32 %v551_v13, %v1665_v33  ;;  %v569_v50 = vadd.f32 %v568_v17, %v567_v37  ;;  %v735_v18 = vadd.f32 %v734_v19, %v1721_v41 }
  0x9f   : > { %v589_v51 = vmax.f32 %v587_v36, %v588_v39  ;;  %v703_v21 = vadd.f32 %v701_v12, %v683_v56  ;;  %v753_v28 = vmax.f32 %v1710_v35, %v752_v15  ;;  %1070 = vpow2.f32 %v946_v40 }
  0xa0   : > { %v1065_v30 = vpop.eup %1064  ;;  %781 = vst [vmem:[%s1768_s19 + $0x8] sm:$0xff] %v777_v46  ;;  %783 = vst [vmem:[%s1768_s19 + $0x18] sm:$0xff] %v779_v49  ;;  %v571_v58 = vmul.f32 0.25, %v569_v50  ;;  %v736_v54 = vrot.slane %v735_v18, 1  ;;  %v654_v25 = vadd.f32 1.0, %v1063_v23 }
  0xa1   : > { %v948_v44 = vmul.f32 -1.442695, %v703_v21  ;;  %v754_v10 = vrot.slane %v753_v28, 2  ;;  %v710_v60 = vadd.f32 1.0, %v1065_v30 }
  0xa2   : > { %v591_v57 = vadd.f32 %v589_v51, %v571_v58  ;;  %v737_v33 = vadd.f32 %v736_v54, %v735_v18 }
  0xa3   : > { %v755_v61 = vmax.f32 %v753_v28, %v754_v10  ;;  %1072 = vpow2.f32 %v948_v44 }
  0xa4   : > { %v944_v34 = vmul.f32 -1.442695, %v591_v57  ;;  %v739_v62 = vmul.f32 0.33333334, %v737_v33 }
  0xa5   : > { %v756_v22 = vrot.slane %v755_v61, 1 }
  0xa6   : > { %v1067_v41 = vpop.eup %1066  ;;  %1074 = vpow2.f32 %v944_v34 }
  0xa7   : > { %v598_v9 = vadd.f32 1.0, %v1067_v41  ;;  %1076 = vrcp.f32 %v654_v25  ;;  %v757_v35 = vmax.f32 %v755_v61, %v756_v22 }
  0xa8   : > { %v1069_v32 = vpop.eup %1068  ;;  %1078 = vrcp.f32 %v710_v60 }
  0xa9   : > { %1080 = vrcp.f32 %v598_v9  ;;  %v766_v15 = vadd.f32 1.0, %v1069_v32  ;;  %v759_v45 = vadd.f32 %v757_v35, %v739_v62 }
  0xab   : > { %1082 = vrcp.f32 %v766_v15  ;;  %v950_v52 = vmul.f32 -1.442695, %v759_v45 }
  0xac   : > { %v1071_v14 = vpop.eup %1070 }
  0xad   : > { %1084 = vpow2.f32 %v950_v52  ;;  %v655_v31 = vadd.f32 1.0, %v1071_v14 }
  0xaf   : > { %1086 = vrcp.f32 %v655_v31 }
  0xb0   : > { %v1073_v63 = vpop.eup %1072 }
  0xb1   : > { %v711_v0 = vadd.f32 1.0, %v1073_v63 }
  0xb3   : > { %v1075_v29 = vpop.eup %1074 }
  0xb4   : > { %v1077_v48 = vpop.eup %1076  ;;  %v599_v42 = vadd.f32 1.0, %v1075_v29 }
  0xb5   : > { %v1079_v1 = vpop.eup %1078 }
  0xb6   : > { %v1081_v38 = vpop.eup %1080  ;;  %1088 = vrcp.f32 %v599_v42 }
  0xb7   : > { %v604_v11 = vsel %vm328_vm12, %v1081_v38, 0.0  ;;  %v606_v19 = vsel %vm329_vm14, %v1081_v38, 0.0  ;;  %1090 = vrcp.f32 %v711_v0 }
  0xb8   : > { %v1083_v27 = vpop.eup %1082  ;;  %v660_v2 = vsel %vm262_vm1, %v1077_v48, %v604_v11  ;;  %v662_v53 = vsel %vm263_vm5, %v1077_v48, %v606_v19 }
  0xb9   : > { %v716_v12 = vsel %vm338_vm2, %v1079_v1, %v660_v2  ;;  %v718_v20 = vsel %vm339_vm7, %v1079_v1, %v662_v53 }
  0xba   : > { %v772_v16 = vsel %vm410_vm8, %v1083_v27, %v716_v12  ;;  %v774_v37 = vsel %vm411_vm9, %v1083_v27, %v718_v20  ;;  %v1085_v55 = vpop.eup %1084 }
  0xbb   : > { %v784_v59 = vmul.f32 %v772_v16, %v1399_v5  ;;  %v786_v43 = vmul.f32 %v774_v37, %v1403_v7  ;;  %v767_v36 = vadd.f32 1.0, %v1085_v55 }
  0xbc   : > { %v1087_v24 = vpop.eup %1086 }
  0xbd   : > { %788 = vst [vmem:[%s1768_s19 + $0x20] sm:$0xff] %v784_v59  ;;  %790 = vst [vmem:[%s1768_s19 + $0x30] sm:$0xff] %v786_v43  ;;  %1092 = vrcp.f32 %v767_v36 }
  0xc3   : > { %v1089_v47 = vpop.eup %1088 }
  0xc4   : > { %v605_v17 = vsel %vm328_vm12, %v1089_v47, 0.0  ;;  %v607_v40 = vsel %vm329_vm14, %v1089_v47, 0.0  ;;  %v1091_v23 = vpop.eup %1090 }
  0xc5   : > { %v661_v5 = vsel %vm262_vm1, %v1087_v24, %v605_v17  ;;  %v663_v7 = vsel %vm263_vm5, %v1087_v24, %v607_v40 }
  0xc6   : > { %v717_v26 = vsel %vm338_vm2, %v1091_v23, %v661_v5  ;;  %v719_v13 = vsel %vm339_vm7, %v1091_v23, %v663_v7 }
  0xca   : > { %v1093_v39 = vpop.eup %1092 }
  0xcb   : > { %v773_v56 = vsel %vm410_vm8, %v1093_v39, %v717_v26  ;;  %v775_v46 = vsel %vm411_vm9, %v1093_v39, %v719_v13 }
  0xcc   : > { %v785_v49 = vmul.f32 %v773_v56, %v1401_v6  ;;  %v787_v50 = vmul.f32 %v775_v46, %v1406_v8 }
  0xce   : > { %789 = vst [vmem:[%s1768_s19 + $0x28] sm:$0xff] %v785_v49  ;;  %791 = vst [vmem:[%s1768_s19 + $0x38] sm:$0xff] %v787_v50 }
  0xcf   : > { %1163 = shalt.err (!%p1160_p7)
}
  0xd0   : > { %s1164_s27 = scalar_lea.hbm %s1860_s8, 1024  ;;  %s1168_s20 = scalar_lea.hbm %s1914_s2, 2048 }
  0xd1   : > { %p1165_p10 = scmp.ne.s32.totalorder %s1860_s8, %s1164_s27  ;;  %p1169_p3 = scmp.lt.s32.totalorder %s1860_s8, %s1914_s2 }
  0xd2   : > { %p1170_p8 = scmp.lt.s32.totalorder %s1168_s20, %s1164_s27 }
  0xd3   : > { %p1166_p1 = pnand %p1165_p10, %p1309_p9 }
  0xd4   : > { %p1171_p0 = por %p1170_p8, %p1169_p3 }
  0xd5   : > { %p1167_p13 = pneg %p1166_p1 }
  0xd7   : > { %p1172_p2 = pnand %p1171_p0, %p1167_p13 }
  0xd9   : > { %1175 = shalt.err (!%p1172_p2)
}
  0xda   : > { %s1241_s21 = smov 256   ;;  %s1242_s19 = smov 16  }
  0xdb   : > { %963 = dma.vmem_to_hbm [thread:$0]  (%p1309_p9), %s1851_s28, 1024, %s1860_s8, %s793_s12, %s1241_s21, %s1241_s21, %s1242_s19  }
  0xdc PF: > { %s823_s29 = sand.u32 1, %s1214_s9   ;;  %p973_p5 = pnand %p924_p12, %p1316_p11 }
  0xdd   : > { %s824_s3 = scalar_lea.sflag [#allocation4], %s823_s29 }
  0xde   : > { %p974_p6 = pneg %p973_p5 }
  0xe0   : > { %1209 = dma.done.wait (%p974_p6), %s824_s3, 1024  }
  0xe1   : > { %1211 = vsyncadd (%p974_p6), %s824_s3, 4294966272  ;;  %s21_s14 = sadd.s32 1, %s1234_s14   ;;  %s1929_s9 = smov %s1218_s10 }
  0xe2   : > { %p18_p4 = scmp.ge.s32.totalorder %s21_s14, 4   ;;  %s1930_s10 = smov %s1222_s11 }
  0xe3   : > { %s1931_s11 = smov %s1314_s23  ;;  %s1932_s12 = smov %s1230_s13 }
  0xe4   : > { %s1933_s13 = smov %s1935_s17  ;;  %20 = sbr.rel (!%p18_p4) target bundleno = 8 (0x8), region = 86 }
  0xe9   :  { %829 = vsyncpa [#allocation3], 1 }
  0xea   :  { %831 = vsyncpa [#allocation3 + $0x1], 1 }
  0xeb   :  { %832 = vsyncpa [#allocation6], 1 }
  0xec   :  { %834 = vsyncpa [#allocation6 + $0x1], 1 }
  0xed   :  { %835 = vsyncpa [#allocation4], 1 }
  0xee   :  { %837 = vsyncpa [#allocation4 + $0x1], 1 }

</bundles_post_ra>
